<compile_context>
chip_gen: v5e
topology: v5e:2x2
jax: 0.10.0
libtpu: 0.0.40
codegen_flags: <defaults>
</compile_context>

<pallas_src>
import functools
import numpy as np
import jax
import jax.numpy as jnp
from jax import lax
from jax.experimental import pallas as pl
from jax.experimental.pallas import tpu as pltpu

# ----------------------------------------------------------------------------
# Deterministic stand-in for cfg (small shapes)
# ----------------------------------------------------------------------------
KW = 4                                   # cfg.DISCRIMINATOR.CONV_SIZE
PADW = int(np.ceil((KW - 1.0) / 2))      # = 2
LRELU_SLOPE = 0.2                        # cfg.DISCRIMINATOR.LEAKY_RELU_SLOPE
N_CHANNELS = 3                           # cfg.INPUT.N_CHANNELS
BASE_DIM = 8                             # cfg.DISCRIMINATOR.BASE_DIM
N_LAYERS = 3                             # cfg.DISCRIMINATOR.N_LAYERS
MAX_DIM = 32                             # cfg.DISCRIMINATOR.MAX_DIM
USE_SIGMOID = False                      # cfg.DISCRIMINATOR.USE_SIGMOID
NORM_EPS = 1e-5                          # nn.InstanceNorm2d default (affine=False)
# NOTE: cfg.DISCRIMINATOR.NORM_LAYER is taken to be InstanceNorm2d (affine=False).

COMPUTE_DTYPE = jnp.bfloat16             # MXU operand / inter-layer storage dtype


# ----------------------------------------------------------------------------
# Pallas kernel: lane-dense conv-as-matmul + instance-norm + leaky-relu (+sigmoid)
# ----------------------------------------------------------------------------
def _layer_kernel(xT_ref, w_ref, b_ref, o_ref, *,
                  use_norm, use_lrelu, use_sigmoid, slope, eps):
    xT = xT_ref[0]                       # (K, P)   bf16 im2col patches (transposed)
    w = w_ref[...]                       # (C, K)   bf16 weights
    b = b_ref[...]                       # (C, 1)   f32 bias column
    # Lane-dense MXU matmul: result (C, P) keeps the large spatial axis on lanes.
    y = jnp.dot(w, xT, preferred_element_type=jnp.float32) + b
    if use_norm:
        # InstanceNorm2d (per sample, per channel, biased variance, affine=False).
        # One-pass statistics: sum and sum-of-squares in a single elementwise pass.
        inv_p = 1.0 / y.shape[1]
        s = jnp.sum(y, axis=1, keepdims=True)
        s2 = jnp.sum(y * y, axis=1, keepdims=True)
        mean = s * inv_p
        var = s2 * inv_p - mean * mean
        y = (y - mean) * lax.rsqrt(var + eps)
    if use_lrelu:
        y = jnp.where(y >= 0, y, slope * y)
    if use_sigmoid:
        y = jax.nn.sigmoid(y)
    o_ref[0] = y.astype(o_ref.dtype)


def conv_block_pallas(patches_T, w_mat, bias_col, *,
                      use_norm, use_lrelu, use_sigmoid, out_dtype):
    """patches_T: (N, K, P) bf16, w_mat: (C, K) bf16, bias_col: (C, 1) f32 -> (N, C, P)."""
    N, K, P = patches_T.shape
    C = w_mat.shape[0]
    kernel = functools.partial(
        _layer_kernel, use_norm=use_norm, use_lrelu=use_lrelu,
        use_sigmoid=use_sigmoid, slope=LRELU_SLOPE, eps=NORM_EPS)
    return pl.pallas_call(
        kernel,
        out_shape=jax.ShapeDtypeStruct((N, C, P), out_dtype),
        grid=(N,),
        in_specs=[
            pl.BlockSpec((1, K, P), lambda n: (n, 0, 0)),    # per-sample patches^T
            pl.BlockSpec((C, K), lambda n: (0, 0)),          # full weight (resident)
            pl.BlockSpec((C, 1), lambda n: (0, 0)),          # bias column (resident)
        ],
        out_specs=pl.BlockSpec((1, C, P), lambda n: (n, 0, 0)),
        compiler_params=pltpu.CompilerParams(dimension_semantics=("parallel",)),
    )(patches_T, w_mat, bias_col)


# ----------------------------------------------------------------------------
# Glue: im2col directly in (N, K, P) layout (no 5-D transpose) + layer plumbing
# ----------------------------------------------------------------------------
def im2col_kp(x_nchw, kw, stride, pad):
    """NCHW input -> (N, C*kw*kw, Ho*Wo) patches; K order = (C, kh, kw), same as OIHW flatten."""
    N, C, H, W = x_nchw.shape
    xp = jnp.pad(x_nchw, ((0, 0), (0, 0), (pad, pad), (pad, pad)))
    Ho = (H + 2 * pad - kw) // stride + 1
    Wo = (W + 2 * pad - kw) // stride + 1
    cols = []
    for ki in range(kw):
        for kj in range(kw):
            cols.append(xp[:, :, ki:ki + stride * Ho:stride, kj:kj + stride * Wo:stride])
    col = jnp.stack(cols, axis=2)                          # (N, C, kw*kw, Ho, Wo)
    col = col.reshape(N, C * kw * kw, Ho * Wo)             # (N, K, P) -- contiguous reshape only
    return col, Ho, Wo


def build_layer_specs():
    """(c_in, c_out, stride, use_norm, use_lrelu, use_sigmoid) per layer."""
    specs = [(N_CHANNELS, BASE_DIM, 2, False, True, False)]
    nf = BASE_DIM
    for _ in range(1, N_LAYERS):
        nf_prev, nf = nf, min(nf * 2, MAX_DIM)
        specs.append((nf_prev, nf, 2, True, True, False))
    nf_prev, nf = nf, min(nf * 2, MAX_DIM)
    specs.append((nf_prev, nf, 1, True, True, False))
    specs.append((nf, 1, 1, False, False, USE_SIGMOID))    # sigmoid folded into last layer
    return specs


def init_params(key, specs):
    params = []
    for (c_in, c_out, _, _, _, _) in specs:
        key, kw_, kb_ = jax.random.split(key, 3)
        w = jax.random.normal(kw_, (c_out, c_in, KW, KW), jnp.float32) * 0.05
        b = jax.random.normal(kb_, (c_out,), jnp.float32) * 0.05
        params.append((w, b))
    return params


def nlayer_discriminator_forward(image_nchw, specs, params,
                                 get_intermediate_features=False):
    res = [image_nchw]
    x = image_nchw.astype(COMPUTE_DTYPE)                   # bf16 activations between layers
    n_layers = len(specs)
    for idx, ((c_in, c_out, stride, use_norm, use_lrelu, use_sigmoid), (w, b)) in \
            enumerate(zip(specs, params)):
        N = x.shape[0]
        patches_T, Ho, Wo = im2col_kp(x, KW, stride, PADW)             # (N, K, P) bf16
        w_mat = w.reshape(c_out, c_in * KW * KW).astype(COMPUTE_DTYPE)  # (C, K) bf16
        bias_col = b.reshape(c_out, 1).astype(jnp.float32)              # (C, 1) f32
        is_last = idx == n_layers - 1
        out_dtype = jnp.float32 if is_last else COMPUTE_DTYPE
        y = conv_block_pallas(patches_T, w_mat, bias_col,
                              use_norm=use_norm, use_lrelu=use_lrelu,
                              use_sigmoid=use_sigmoid, out_dtype=out_dtype)  # (N, C, P)
        y_nchw = y.reshape(N, c_out, Ho, Wo)               # free: (C, P) is already CHW
        res.append(y_nchw)
        x = y_nchw
    if get_intermediate_features:
        return [r.astype(jnp.float32) for r in res[1:]]
    return res[-1]


# ----------------------------------------------------------------------------
# Pure-JAX reference with matching precision (bf16 operands, f32 accumulation,
# f32 norm/activation, bf16 inter-layer storage)
# ----------------------------------------------------------------------------
def reference_forward(image_nchw, specs, params):
    x = image_nchw.astype(COMPUTE_DTYPE)
    y = None
    for (c_in, c_out, stride, use_norm, use_lrelu, use_sigmoid), (w, b) in zip(specs, params):
        y = lax.conv_general_dilated(
            x, w.astype(COMPUTE_DTYPE), (stride, stride),
            [(PADW, PADW), (PADW, PADW)],
            dimension_numbers=('NCHW', 'OIHW', 'NCHW'),
            preferred_element_type=jnp.float32)
        y = y + b[None, :, None, None]
        if use_norm:
            mean = y.mean(axis=(2, 3), keepdims=True)
            var = jnp.square(y - mean).mean(axis=(2, 3), keepdims=True)
            y = (y - mean) * lax.rsqrt(var + NORM_EPS)
        if use_lrelu:
            y = jnp.where(y >= 0, y, LRELU_SLOPE * y)
        if use_sigmoid:
            y = jax.nn.sigmoid(y)
        x = y.astype(COMPUTE_DTYPE)
    return y


if __name__ == "__main__":
    key = jax.random.PRNGKey(0)
    k_img, k_par = jax.random.split(key)
    image = jax.random.normal(k_img, (2, N_CHANNELS, 16, 16), jnp.float32)  # NCHW

    specs = build_layer_specs()
    params = init_params(k_par, specs)

    @jax.jit
    def run(img, prm):
        return nlayer_discriminator_forward(img, specs, prm)

    out = jax.block_until_ready(run(image, params))

    ref = jax.block_until_ready(reference_forward(image, specs, params))
    assert out.shape == ref.shape, (out.shape, ref.shape)
    np.testing.assert_allclose(np.asarray(out), np.asarray(ref), rtol=1e-2, atol=1e-2)

    print("KERNEL_OK")
</pallas_src>

<mosaic_0001>
module attributes {stable_mosaic.version = 11 : i64} {
  func.func @_layer_kernel(%arg0: i32, %arg1: memref<1x48x81xbf16, #tpu.memory_space<vmem>>, %arg2: memref<8x48xbf16, #tpu.memory_space<vmem>>, %arg3: memref<8x1xf32, #tpu.memory_space<vmem>>, %arg4: memref<1x8x81xbf16, #tpu.memory_space<vmem>>) attributes {dimension_semantics = [#tpu.dimension_semantics<parallel>], iteration_bounds = array<i64: 2>, scalar_prefetch = 0 : i64, scratch_operands = 0 : i64, tpu.core_type = #tpu.core_type<tc>, window_params = [{transform_indices = @transform_0, window_bounds = array<i64: 1, 48, 81>}, {pipeline_mode = #tpu.pipeline_mode<synchronous>, transform_indices = @transform_1, window_bounds = array<i64: 8, 48>}, {pipeline_mode = #tpu.pipeline_mode<synchronous>, transform_indices = @transform_2, window_bounds = array<i64: 8, 1>}, {transform_indices = @transform_3, window_bounds = array<i64: 1, 8, 81>}]} {
    %c0 = arith.constant 0 : index
    %c0_0 = arith.constant 0 : index
    %c0_1 = arith.constant 0 : index
    %0 = vector.load %arg1[%c0, %c0_0, %c0_1] : memref<1x48x81xbf16, #tpu.memory_space<vmem>>, vector<1x48x81xbf16>
    %1 = vector.shape_cast %0 : vector<1x48x81xbf16> to vector<48x81xbf16>
    %c0_2 = arith.constant 0 : index
    %c0_3 = arith.constant 0 : index
    %2 = vector.load %arg2[%c0_2, %c0_3] : memref<8x48xbf16, #tpu.memory_space<vmem>>, vector<8x48xbf16>
    %c0_4 = arith.constant 0 : index
    %c0_5 = arith.constant 0 : index
    %3 = vector.load %arg3[%c0_4, %c0_5] : memref<8x1xf32, #tpu.memory_space<vmem>>, vector<8x1xf32>
    %cst = arith.constant dense<0.000000e+00> : vector<8x81xf32>
    %4 = tpu.matmul %2, %1, %cst {dimension_numbers = #tpu.dot_dimension_numbers<[1], [0], [0], [1], [0, 0, 1, 1], [], []>} : vector<8x48xbf16>, vector<48x81xbf16>, vector<8x81xf32> -> vector<8x81xf32>
    %5 = vector.broadcast %3 : vector<8x1xf32> to vector<8x81xf32>
    %6 = arith.addf %4, %5 : vector<8x81xf32>
    %cst_6 = arith.constant 0.000000e+00 : f32
    %7 = vector.broadcast %cst_6 : f32 to vector<8x81xf32>
    %8 = arith.cmpf oge, %6, %7 : vector<8x81xf32>
    %cst_7 = arith.constant 2.000000e-01 : f32
    %9 = vector.broadcast %cst_7 : f32 to vector<8x81xf32>
    %10 = arith.mulf %9, %6 : vector<8x81xf32>
    %11 = arith.select %8, %6, %10 : vector<8x81xi1>, vector<8x81xf32>
    %12 = arith.truncf %11 : vector<8x81xf32> to vector<8x81xbf16>
    %c0_8 = arith.constant 0 : index
    %c0_9 = arith.constant 0 : index
    %c0_10 = arith.constant 0 : index
    %13 = vector.load %arg4[%c0_8, %c0_9, %c0_10] : memref<1x8x81xbf16, #tpu.memory_space<vmem>>, vector<1x8x81xbf16>
    %14 = vector.shape_cast %13 : vector<1x8x81xbf16> to vector<8x81xbf16>
    %15 = vector.shape_cast %12 : vector<8x81xbf16> to vector<1x8x81xbf16>
    tpu.vector_store %arg4[%c0_8, %c0_9, %c0_10], %15 {strides = array<i32>} : memref<1x8x81xbf16, #tpu.memory_space<vmem>>, vector<1x8x81xbf16>,
    return
  }
  func.func @transform_0(%arg0: i32) -> (i32, i32, i32) {
    %c0_i32 = arith.constant 0 : i32
    %c0_i32_0 = arith.constant 0 : i32
    %c0_i32_1 = arith.constant 0 : i32
    return %arg0, %c0_i32, %c0_i32_0 : i32, i32, i32
  }
  func.func @transform_1(%arg0: i32) -> (i32, i32) {
    %c0_i32 = arith.constant 0 : i32
    %c0_i32_0 = arith.constant 0 : i32
    %c0_i32_1 = arith.constant 0 : i32
    return %c0_i32, %c0_i32_0 : i32, i32
  }
  func.func @transform_2(%arg0: i32) -> (i32, i32) {
    %c0_i32 = arith.constant 0 : i32
    %c0_i32_0 = arith.constant 0 : i32
    %c0_i32_1 = arith.constant 0 : i32
    return %c0_i32, %c0_i32_0 : i32, i32
  }
  func.func @transform_3(%arg0: i32) -> (i32, i32, i32) {
    %c0_i32 = arith.constant 0 : i32
    %c0_i32_0 = arith.constant 0 : i32
    %c0_i32_1 = arith.constant 0 : i32
    return %arg0, %c0_i32, %c0_i32_0 : i32, i32, i32
  }
}

module attributes {stable_mosaic.version = 11 : i64} {
  func.func @_layer_kernel(%arg0: i32, %arg1: memref<1x128x25xbf16, #tpu.memory_space<vmem>>, %arg2: memref<16x128xbf16, #tpu.memory_space<vmem>>, %arg3: memref<16x1xf32, #tpu.memory_space<vmem>>, %arg4: memref<1x16x25xbf16, #tpu.memory_space<vmem>>) attributes {dimension_semantics = [#tpu.dimension_semantics<parallel>], iteration_bounds = array<i64: 2>, scalar_prefetch = 0 : i64, scratch_operands = 0 : i64, tpu.core_type = #tpu.core_type<tc>, window_params = [{transform_indices = @transform_0, window_bounds = array<i64: 1, 128, 25>}, {pipeline_mode = #tpu.pipeline_mode<synchronous>, transform_indices = @transform_1, window_bounds = array<i64: 16, 128>}, {pipeline_mode = #tpu.pipeline_mode<synchronous>, transform_indices = @transform_2, window_bounds = array<i64: 16, 1>}, {transform_indices = @transform_3, window_bounds = array<i64: 1, 16, 25>}]} {
    %c0 = arith.constant 0 : index
    %c0_0 = arith.constant 0 : index
    %c0_1 = arith.constant 0 : index
    %0 = vector.load %arg1[%c0, %c0_0, %c0_1] : memref<1x128x25xbf16, #tpu.memory_space<vmem>>, vector<1x128x25xbf16>
    %1 = vector.shape_cast %0 : vector<1x128x25xbf16> to vector<128x25xbf16>
    %c0_2 = arith.constant 0 : index
    %c0_3 = arith.constant 0 : index
    %2 = vector.load %arg2[%c0_2, %c0_3] : memref<16x128xbf16, #tpu.memory_space<vmem>>, vector<16x128xbf16>
    %c0_4 = arith.constant 0 : index
    %c0_5 = arith.constant 0 : index
    %3 = vector.load %arg3[%c0_4, %c0_5] : memref<16x1xf32, #tpu.memory_space<vmem>>, vector<16x1xf32>
    %cst = arith.constant dense<0.000000e+00> : vector<16x25xf32>
    %4 = tpu.matmul %2, %1, %cst {dimension_numbers = #tpu.dot_dimension_numbers<[1], [0], [0], [1], [0, 0, 1, 1], [], []>} : vector<16x128xbf16>, vector<128x25xbf16>, vector<16x25xf32> -> vector<16x25xf32>
    %5 = vector.broadcast %3 : vector<16x1xf32> to vector<16x25xf32>
    %6 = arith.addf %4, %5 : vector<16x25xf32>
    %cst_6 = arith.constant dense<0.000000e+00> : vector<16xf32>
    %7 = vector.multi_reduction <add>, %6, %cst_6 [1] : vector<16x25xf32> to vector<16xf32>
    %8 = vector.shape_cast %7 : vector<16xf32> to vector<16x1xf32>
    %9 = arith.mulf %6, %6 : vector<16x25xf32>
    %cst_7 = arith.constant dense<0.000000e+00> : vector<16xf32>
    %10 = vector.multi_reduction <add>, %9, %cst_7 [1] : vector<16x25xf32> to vector<16xf32>
    %11 = vector.shape_cast %10 : vector<16xf32> to vector<16x1xf32>
    %cst_8 = arith.constant 4.000000e-02 : f32
    %12 = vector.broadcast %cst_8 : f32 to vector<16x1xf32>
    %13 = arith.mulf %8, %12 : vector<16x1xf32>
    %cst_9 = arith.constant 4.000000e-02 : f32
    %14 = vector.broadcast %cst_9 : f32 to vector<16x1xf32>
    %15 = arith.mulf %11, %14 : vector<16x1xf32>
    %16 = arith.mulf %13, %13 : vector<16x1xf32>
    %17 = arith.subf %15, %16 : vector<16x1xf32>
    %18 = vector.broadcast %13 : vector<16x1xf32> to vector<16x25xf32>
    %19 = arith.subf %6, %18 : vector<16x25xf32>
    %cst_10 = arith.constant 9.99999974E-6 : f32
    %20 = vector.broadcast %cst_10 : f32 to vector<16x1xf32>
    %21 = arith.addf %17, %20 : vector<16x1xf32>
    %22 = math.rsqrt %21 : vector<16x1xf32>
    %23 = vector.broadcast %22 : vector<16x1xf32> to vector<16x25xf32>
    %24 = arith.mulf %19, %23 : vector<16x25xf32>
    %cst_11 = arith.constant 0.000000e+00 : f32
    %25 = vector.broadcast %cst_11 : f32 to vector<16x25xf32>
    %26 = arith.cmpf oge, %24, %25 : vector<16x25xf32>
    %cst_12 = arith.constant 2.000000e-01 : f32
    %27 = vector.broadcast %cst_12 : f32 to vector<16x25xf32>
    %28 = arith.mulf %27, %24 : vector<16x25xf32>
    %29 = arith.select %26, %24, %28 : vector<16x25xi1>, vector<16x25xf32>
    %30 = arith.truncf %29 : vector<16x25xf32> to vector<16x25xbf16>
    %c0_13 = arith.constant 0 : index
    %c0_14 = arith.constant 0 : index
    %c0_15 = arith.constant 0 : index
    %31 = vector.load %arg4[%c0_13, %c0_14, %c0_15] : memref<1x16x25xbf16, #tpu.memory_space<vmem>>, vector<1x16x25xbf16>
    %32 = vector.shape_cast %31 : vector<1x16x25xbf16> to vector<16x25xbf16>
    %33 = vector.shape_cast %30 : vector<16x25xbf16> to vector<1x16x25xbf16>
    tpu.vector_store %arg4[%c0_13, %c0_14, %c0_15], %33 {strides = array<i32>} : memref<1x16x25xbf16, #tpu.memory_space<vmem>>, vector<1x16x25xbf16>,
    return
  }
  func.func @transform_0(%arg0: i32) -> (i32, i32, i32) {
    %c0_i32 = arith.constant 0 : i32
    %c0_i32_0 = arith.constant 0 : i32
    %c0_i32_1 = arith.constant 0 : i32
    return %arg0, %c0_i32, %c0_i32_0 : i32, i32, i32
  }
  func.func @transform_1(%arg0: i32) -> (i32, i32) {
    %c0_i32 = arith.constant 0 : i32
    %c0_i32_0 = arith.constant 0 : i32
    %c0_i32_1 = arith.constant 0 : i32
    return %c0_i32, %c0_i32_0 : i32, i32
  }
  func.func @transform_2(%arg0: i32) -> (i32, i32) {
    %c0_i32 = arith.constant 0 : i32
    %c0_i32_0 = arith.constant 0 : i32
    %c0_i32_1 = arith.constant 0 : i32
    return %c0_i32, %c0_i32_0 : i32, i32
  }
  func.func @transform_3(%arg0: i32) -> (i32, i32, i32) {
    %c0_i32 = arith.constant 0 : i32
    %c0_i32_0 = arith.constant 0 : i32
    %c0_i32_1 = arith.constant 0 : i32
    return %arg0, %c0_i32, %c0_i32_0 : i32, i32, i32
  }
}

module attributes {stable_mosaic.version = 11 : i64} {
  func.func @_layer_kernel(%arg0: i32, %arg1: memref<1x256x9xbf16, #tpu.memory_space<vmem>>, %arg2: memref<32x256xbf16, #tpu.memory_space<vmem>>, %arg3: memref<32x1xf32, #tpu.memory_space<vmem>>, %arg4: memref<1x32x9xbf16, #tpu.memory_space<vmem>>) attributes {dimension_semantics = [#tpu.dimension_semantics<parallel>], iteration_bounds = array<i64: 2>, scalar_prefetch = 0 : i64, scratch_operands = 0 : i64, tpu.core_type = #tpu.core_type<tc>, window_params = [{transform_indices = @transform_0, window_bounds = array<i64: 1, 256, 9>}, {pipeline_mode = #tpu.pipeline_mode<synchronous>, transform_indices = @transform_1, window_bounds = array<i64: 32, 256>}, {pipeline_mode = #tpu.pipeline_mode<synchronous>, transform_indices = @transform_2, window_bounds = array<i64: 32, 1>}, {transform_indices = @transform_3, window_bounds = array<i64: 1, 32, 9>}]} {
    %c0 = arith.constant 0 : index
    %c0_0 = arith.constant 0 : index
    %c0_1 = arith.constant 0 : index
    %0 = vector.load %arg1[%c0, %c0_0, %c0_1] : memref<1x256x9xbf16, #tpu.memory_space<vmem>>, vector<1x256x9xbf16>
    %1 = vector.shape_cast %0 : vector<1x256x9xbf16> to vector<256x9xbf16>
    %c0_2 = arith.constant 0 : index
    %c0_3 = arith.constant 0 : index
    %2 = vector.load %arg2[%c0_2, %c0_3] : memref<32x256xbf16, #tpu.memory_space<vmem>>, vector<32x256xbf16>
    %c0_4 = arith.constant 0 : index
    %c0_5 = arith.constant 0 : index
    %3 = vector.load %arg3[%c0_4, %c0_5] : memref<32x1xf32, #tpu.memory_space<vmem>>, vector<32x1xf32>
    %cst = arith.constant dense<0.000000e+00> : vector<32x9xf32>
    %4 = tpu.matmul %2, %1, %cst {dimension_numbers = #tpu.dot_dimension_numbers<[1], [0], [0], [1], [0, 0, 1, 1], [], []>} : vector<32x256xbf16>, vector<256x9xbf16>, vector<32x9xf32> -> vector<32x9xf32>
    %5 = vector.broadcast %3 : vector<32x1xf32> to vector<32x9xf32>
    %6 = arith.addf %4, %5 : vector<32x9xf32>
    %cst_6 = arith.constant dense<0.000000e+00> : vector<32xf32>
    %7 = vector.multi_reduction <add>, %6, %cst_6 [1] : vector<32x9xf32> to vector<32xf32>
    %8 = vector.shape_cast %7 : vector<32xf32> to vector<32x1xf32>
    %9 = arith.mulf %6, %6 : vector<32x9xf32>
    %cst_7 = arith.constant dense<0.000000e+00> : vector<32xf32>
    %10 = vector.multi_reduction <add>, %9, %cst_7 [1] : vector<32x9xf32> to vector<32xf32>
    %11 = vector.shape_cast %10 : vector<32xf32> to vector<32x1xf32>
    %cst_8 = arith.constant 0.111111112 : f32
    %12 = vector.broadcast %cst_8 : f32 to vector<32x1xf32>
    %13 = arith.mulf %8, %12 : vector<32x1xf32>
    %cst_9 = arith.constant 0.111111112 : f32
    %14 = vector.broadcast %cst_9 : f32 to vector<32x1xf32>
    %15 = arith.mulf %11, %14 : vector<32x1xf32>
    %16 = arith.mulf %13, %13 : vector<32x1xf32>
    %17 = arith.subf %15, %16 : vector<32x1xf32>
    %18 = vector.broadcast %13 : vector<32x1xf32> to vector<32x9xf32>
    %19 = arith.subf %6, %18 : vector<32x9xf32>
    %cst_10 = arith.constant 9.99999974E-6 : f32
    %20 = vector.broadcast %cst_10 : f32 to vector<32x1xf32>
    %21 = arith.addf %17, %20 : vector<32x1xf32>
    %22 = math.rsqrt %21 : vector<32x1xf32>
    %23 = vector.broadcast %22 : vector<32x1xf32> to vector<32x9xf32>
    %24 = arith.mulf %19, %23 : vector<32x9xf32>
    %cst_11 = arith.constant 0.000000e+00 : f32
    %25 = vector.broadcast %cst_11 : f32 to vector<32x9xf32>
    %26 = arith.cmpf oge, %24, %25 : vector<32x9xf32>
    %cst_12 = arith.constant 2.000000e-01 : f32
    %27 = vector.broadcast %cst_12 : f32 to vector<32x9xf32>
    %28 = arith.mulf %27, %24 : vector<32x9xf32>
    %29 = arith.select %26, %24, %28 : vector<32x9xi1>, vector<32x9xf32>
    %30 = arith.truncf %29 : vector<32x9xf32> to vector<32x9xbf16>
    %c0_13 = arith.constant 0 : index
    %c0_14 = arith.constant 0 : index
    %c0_15 = arith.constant 0 : index
    %31 = vector.load %arg4[%c0_13, %c0_14, %c0_15] : memref<1x32x9xbf16, #tpu.memory_space<vmem>>, vector<1x32x9xbf16>
    %32 = vector.shape_cast %31 : vector<1x32x9xbf16> to vector<32x9xbf16>
    %33 = vector.shape_cast %30 : vector<32x9xbf16> to vector<1x32x9xbf16>
    tpu.vector_store %arg4[%c0_13, %c0_14, %c0_15], %33 {strides = array<i32>} : memref<1x32x9xbf16, #tpu.memory_space<vmem>>, vector<1x32x9xbf16>,
    return
  }
  func.func @transform_0(%arg0: i32) -> (i32, i32, i32) {
    %c0_i32 = arith.constant 0 : i32
    %c0_i32_0 = arith.constant 0 : i32
    %c0_i32_1 = arith.constant 0 : i32
    return %arg0, %c0_i32, %c0_i32_0 : i32, i32, i32
  }
  func.func @transform_1(%arg0: i32) -> (i32, i32) {
    %c0_i32 = arith.constant 0 : i32
    %c0_i32_0 = arith.constant 0 : i32
    %c0_i32_1 = arith.constant 0 : i32
    return %c0_i32, %c0_i32_0 : i32, i32
  }
  func.func @transform_2(%arg0: i32) -> (i32, i32) {
    %c0_i32 = arith.constant 0 : i32
    %c0_i32_0 = arith.constant 0 : i32
    %c0_i32_1 = arith.constant 0 : i32
    return %c0_i32, %c0_i32_0 : i32, i32
  }
  func.func @transform_3(%arg0: i32) -> (i32, i32, i32) {
    %c0_i32 = arith.constant 0 : i32
    %c0_i32_0 = arith.constant 0 : i32
    %c0_i32_1 = arith.constant 0 : i32
    return %arg0, %c0_i32, %c0_i32_0 : i32, i32, i32
  }
}

module attributes {stable_mosaic.version = 11 : i64} {
  func.func @_layer_kernel(%arg0: i32, %arg1: memref<1x512x16xbf16, #tpu.memory_space<vmem>>, %arg2: memref<32x512xbf16, #tpu.memory_space<vmem>>, %arg3: memref<32x1xf32, #tpu.memory_space<vmem>>, %arg4: memref<1x32x16xbf16, #tpu.memory_space<vmem>>) attributes {dimension_semantics = [#tpu.dimension_semantics<parallel>], iteration_bounds = array<i64: 2>, scalar_prefetch = 0 : i64, scratch_operands = 0 : i64, tpu.core_type = #tpu.core_type<tc>, window_params = [{transform_indices = @transform_0, window_bounds = array<i64: 1, 512, 16>}, {pipeline_mode = #tpu.pipeline_mode<synchronous>, transform_indices = @transform_1, window_bounds = array<i64: 32, 512>}, {pipeline_mode = #tpu.pipeline_mode<synchronous>, transform_indices = @transform_2, window_bounds = array<i64: 32, 1>}, {transform_indices = @transform_3, window_bounds = array<i64: 1, 32, 16>}]} {
    %c0 = arith.constant 0 : index
    %c0_0 = arith.constant 0 : index
    %c0_1 = arith.constant 0 : index
    %0 = vector.load %arg1[%c0, %c0_0, %c0_1] : memref<1x512x16xbf16, #tpu.memory_space<vmem>>, vector<1x512x16xbf16>
    %1 = vector.shape_cast %0 : vector<1x512x16xbf16> to vector<512x16xbf16>
    %c0_2 = arith.constant 0 : index
    %c0_3 = arith.constant 0 : index
    %2 = vector.load %arg2[%c0_2, %c0_3] : memref<32x512xbf16, #tpu.memory_space<vmem>>, vector<32x512xbf16>
    %c0_4 = arith.constant 0 : index
    %c0_5 = arith.constant 0 : index
    %3 = vector.load %arg3[%c0_4, %c0_5] : memref<32x1xf32, #tpu.memory_space<vmem>>, vector<32x1xf32>
    %cst = arith.constant dense<0.000000e+00> : vector<32x16xf32>
    %4 = tpu.matmul %2, %1, %cst {dimension_numbers = #tpu.dot_dimension_numbers<[1], [0], [0], [1], [0, 0, 1, 1], [], []>} : vector<32x512xbf16>, vector<512x16xbf16>, vector<32x16xf32> -> vector<32x16xf32>
    %5 = vector.broadcast %3 : vector<32x1xf32> to vector<32x16xf32>
    %6 = arith.addf %4, %5 : vector<32x16xf32>
    %cst_6 = arith.constant dense<0.000000e+00> : vector<32xf32>
    %7 = vector.multi_reduction <add>, %6, %cst_6 [1] : vector<32x16xf32> to vector<32xf32>
    %8 = vector.shape_cast %7 : vector<32xf32> to vector<32x1xf32>
    %9 = arith.mulf %6, %6 : vector<32x16xf32>
    %cst_7 = arith.constant dense<0.000000e+00> : vector<32xf32>
    %10 = vector.multi_reduction <add>, %9, %cst_7 [1] : vector<32x16xf32> to vector<32xf32>
    %11 = vector.shape_cast %10 : vector<32xf32> to vector<32x1xf32>
    %cst_8 = arith.constant 6.250000e-02 : f32
    %12 = vector.broadcast %cst_8 : f32 to vector<32x1xf32>
    %13 = arith.mulf %8, %12 : vector<32x1xf32>
    %cst_9 = arith.constant 6.250000e-02 : f32
    %14 = vector.broadcast %cst_9 : f32 to vector<32x1xf32>
    %15 = arith.mulf %11, %14 : vector<32x1xf32>
    %16 = arith.mulf %13, %13 : vector<32x1xf32>
    %17 = arith.subf %15, %16 : vector<32x1xf32>
    %18 = vector.broadcast %13 : vector<32x1xf32> to vector<32x16xf32>
    %19 = arith.subf %6, %18 : vector<32x16xf32>
    %cst_10 = arith.constant 9.99999974E-6 : f32
    %20 = vector.broadcast %cst_10 : f32 to vector<32x1xf32>
    %21 = arith.addf %17, %20 : vector<32x1xf32>
    %22 = math.rsqrt %21 : vector<32x1xf32>
    %23 = vector.broadcast %22 : vector<32x1xf32> to vector<32x16xf32>
    %24 = arith.mulf %19, %23 : vector<32x16xf32>
    %cst_11 = arith.constant 0.000000e+00 : f32
    %25 = vector.broadcast %cst_11 : f32 to vector<32x16xf32>
    %26 = arith.cmpf oge, %24, %25 : vector<32x16xf32>
    %cst_12 = arith.constant 2.000000e-01 : f32
    %27 = vector.broadcast %cst_12 : f32 to vector<32x16xf32>
    %28 = arith.mulf %27, %24 : vector<32x16xf32>
    %29 = arith.select %26, %24, %28 : vector<32x16xi1>, vector<32x16xf32>
    %30 = arith.truncf %29 : vector<32x16xf32> to vector<32x16xbf16>
    %c0_13 = arith.constant 0 : index
    %c0_14 = arith.constant 0 : index
    %c0_15 = arith.constant 0 : index
    %31 = vector.load %arg4[%c0_13, %c0_14, %c0_15] : memref<1x32x16xbf16, #tpu.memory_space<vmem>>, vector<1x32x16xbf16>
    %32 = vector.shape_cast %31 : vector<1x32x16xbf16> to vector<32x16xbf16>
    %33 = vector.shape_cast %30 : vector<32x16xbf16> to vector<1x32x16xbf16>
    tpu.vector_store %arg4[%c0_13, %c0_14, %c0_15], %33 {strides = array<i32>} : memref<1x32x16xbf16, #tpu.memory_space<vmem>>, vector<1x32x16xbf16>,
    return
  }
  func.func @transform_0(%arg0: i32) -> (i32, i32, i32) {
    %c0_i32 = arith.constant 0 : i32
    %c0_i32_0 = arith.constant 0 : i32
    %c0_i32_1 = arith.constant 0 : i32
    return %arg0, %c0_i32, %c0_i32_0 : i32, i32, i32
  }
  func.func @transform_1(%arg0: i32) -> (i32, i32) {
    %c0_i32 = arith.constant 0 : i32
    %c0_i32_0 = arith.constant 0 : i32
    %c0_i32_1 = arith.constant 0 : i32
    return %c0_i32, %c0_i32_0 : i32, i32
  }
  func.func @transform_2(%arg0: i32) -> (i32, i32) {
    %c0_i32 = arith.constant 0 : i32
    %c0_i32_0 = arith.constant 0 : i32
    %c0_i32_1 = arith.constant 0 : i32
    return %c0_i32, %c0_i32_0 : i32, i32
  }
  func.func @transform_3(%arg0: i32) -> (i32, i32, i32) {
    %c0_i32 = arith.constant 0 : i32
    %c0_i32_0 = arith.constant 0 : i32
    %c0_i32_1 = arith.constant 0 : i32
    return %arg0, %c0_i32, %c0_i32_0 : i32, i32, i32
  }
}

module attributes {stable_mosaic.version = 11 : i64} {
  func.func @_layer_kernel(%arg0: i32, %arg1: memref<1x512x25xbf16, #tpu.memory_space<vmem>>, %arg2: memref<1x512xbf16, #tpu.memory_space<vmem>>, %arg3: memref<1x1xf32, #tpu.memory_space<vmem>>, %arg4: memref<1x1x25xf32, #tpu.memory_space<vmem>>) attributes {dimension_semantics = [#tpu.dimension_semantics<parallel>], iteration_bounds = array<i64: 2>, scalar_prefetch = 0 : i64, scratch_operands = 0 : i64, tpu.core_type = #tpu.core_type<tc>, window_params = [{transform_indices = @transform_0, window_bounds = array<i64: 1, 512, 25>}, {pipeline_mode = #tpu.pipeline_mode<synchronous>, transform_indices = @transform_1, window_bounds = array<i64: 1, 512>}, {pipeline_mode = #tpu.pipeline_mode<synchronous>, transform_indices = @transform_2, window_bounds = array<i64: 1, 1>}, {transform_indices = @transform_3, window_bounds = array<i64: 1, 1, 25>}]} {
    %c0 = arith.constant 0 : index
    %c0_0 = arith.constant 0 : index
    %c0_1 = arith.constant 0 : index
    %0 = vector.load %arg1[%c0, %c0_0, %c0_1] : memref<1x512x25xbf16, #tpu.memory_space<vmem>>, vector<1x512x25xbf16>
    %1 = vector.shape_cast %0 : vector<1x512x25xbf16> to vector<512x25xbf16>
    %c0_2 = arith.constant 0 : index
    %c0_3 = arith.constant 0 : index
    %2 = vector.load %arg2[%c0_2, %c0_3] : memref<1x512xbf16, #tpu.memory_space<vmem>>, vector<1x512xbf16>
    %c0_4 = arith.constant 0 : index
    %c0_5 = arith.constant 0 : index
    %3 = vector.load %arg3[%c0_4, %c0_5] : memref<1x1xf32, #tpu.memory_space<vmem>>, vector<1x1xf32>
    %cst = arith.constant dense<0.000000e+00> : vector<1x25xf32>
    %4 = tpu.matmul %2, %1, %cst {dimension_numbers = #tpu.dot_dimension_numbers<[1], [0], [0], [1], [0, 0, 1, 1], [], []>} : vector<1x512xbf16>, vector<512x25xbf16>, vector<1x25xf32> -> vector<1x25xf32>
    %5 = vector.broadcast %3 : vector<1x1xf32> to vector<1x25xf32>
    %6 = arith.addf %4, %5 : vector<1x25xf32>
    %c0_6 = arith.constant 0 : index
    %c0_7 = arith.constant 0 : index
    %c0_8 = arith.constant 0 : index
    %7 = vector.load %arg4[%c0_6, %c0_7, %c0_8] : memref<1x1x25xf32, #tpu.memory_space<vmem>>, vector<1x1x25xf32>
    %8 = vector.shape_cast %7 : vector<1x1x25xf32> to vector<1x25xf32>
    %9 = vector.shape_cast %6 : vector<1x25xf32> to vector<1x1x25xf32>
    tpu.vector_store %arg4[%c0_6, %c0_7, %c0_8], %9 {strides = array<i32>} : memref<1x1x25xf32, #tpu.memory_space<vmem>>, vector<1x1x25xf32>,
    return
  }
  func.func @transform_0(%arg0: i32) -> (i32, i32, i32) {
    %c0_i32 = arith.constant 0 : i32
    %c0_i32_0 = arith.constant 0 : i32
    %c0_i32_1 = arith.constant 0 : i32
    return %arg0, %c0_i32, %c0_i32_0 : i32, i32, i32
  }
  func.func @transform_1(%arg0: i32) -> (i32, i32) {
    %c0_i32 = arith.constant 0 : i32
    %c0_i32_0 = arith.constant 0 : i32
    %c0_i32_1 = arith.constant 0 : i32
    return %c0_i32, %c0_i32_0 : i32, i32
  }
  func.func @transform_2(%arg0: i32) -> (i32, i32) {
    %c0_i32 = arith.constant 0 : i32
    %c0_i32_0 = arith.constant 0 : i32
    %c0_i32_1 = arith.constant 0 : i32
    return %c0_i32, %c0_i32_0 : i32, i32
  }
  func.func @transform_3(%arg0: i32) -> (i32, i32, i32) {
    %c0_i32 = arith.constant 0 : i32
    %c0_i32_0 = arith.constant 0 : i32
    %c0_i32_1 = arith.constant 0 : i32
    return %arg0, %c0_i32, %c0_i32_0 : i32, i32, i32
  }
}

</mosaic_0001>

<bundles_post_ra>
// kernel: run.5
= control target key start
LH: loop header
LB: loop body
LE: loop exit
PB: predicated region body
PF: predicated region fallthrough
CT: control target
= control target key end

     0   :  { %s342_s12 = smov 0   ;;  %s365_s0 = inlined_call_operand.vmem [shape: bf16[2,48,81], index: 0, kind: input, shape index: {}]   ;;  %s366_s1 = inlined_call_operand.vmem [shape: bf16[8,48], index: 1, kind: input, shape index: {}]   ;;  %s367_s2 = inlined_call_operand.vmem [shape: f32[8,1], index: 2, kind: input, shape index: {}]   ;;  %s368_s3 = inlined_call_operand.vmem [shape: bf16[2,8,81], index: 3, kind: output, shape index: {}]  }
   0x1 LB: > { %s277_s13 = sadd.s32 4294967295, %s319_s12   ;;  %p281_p0 = scmp.ge.s32.totalorder %s319_s12, 1  ;;  %s319_s12 = sphi %s342_s12, %s13_s12  }
   0x2   : > { %p137_p1 = scmp.lt.s32.totalorder %s319_s12, 3 }
   0x4   : > { %p138_p2 = pnand %p281_p0, %p137_p1 }
   0x5   : > { %p160_p3 = scmp.lt.s32.totalorder (!%p138_p2), %s277_s13, 1 }
   0x6   : > { %141 = sbr.rel (%p138_p2) target bundleno = 161 (0xa1), region = 32 }
   0xb   : > { %v177_v0 = vld [vmem:[%s367_s2] sm:$0xff]  ;;  %v321_v1 = vmov 0   ;;  %s370_s13 = smov (!%p160_p3, %s277_s13), 1  ;;  %vm201_vm0 = vcmask 392192   ;;  %vm222_vm2 = vcmask 658432  }
   0xc   : > { %312 = vset.pattern.permute.xlu0 %v321_v1  ;;  %s302_s16 = smul.u32 24, %s370_s13  ;;  %v176_v5 = vld [vmem:[%s366_s1] sm:$0xf]  ;;  %s283_s22 = sshll.u32 %s370_s13, 2 }
   0xd   : > { %180 = vperm.xlu0 %312, %v177_v0   ;;  %s168_s25 = scalar_lea.vmem %s368_s3, %s283_s22 }
   0xe   : > { %s164_s19 = scalar_lea.vmem %s365_s0, %s302_s16 }
   0xf   : > { %v301_v2 = vld [vmem:[%s164_s19 + $0x10] sm:$0xff]  ;;  %v300_v3 = vld [vmem:[%s164_s19 + $0x8] sm:$0xff]  ;;  %v299_v4 = vld [vmem:[%s164_s19] sm:$0xff] }
  0x10   : > { %210 = vmatpush.bf16.msra.mxu0 %v301_v2 }
  0x14   : > { %211 = vmatpush.bf16.msra.mxu0 %v300_v3 }
  0x18   : > { %212 = vmatpush.bf16.msra.mxu0 %v299_v4 }
  0x1b   : > { %296 = vmatmul.msk.bf16.vlgmr.msra.gmra.mxu0 %vm201_vm0, %v176_v5 }
  0x7f   : > { %v181_v6 = vpop.permute.xlu0 %180 }
  0x98   : > { %v214_v7 = vpop.f32.mrf.mxu0 }
  0x99   : > { %v215_v8 = vadd.f32 %v214_v7, %v181_v6 }
  0x9b   : > { %vm218_vm1 = vcmp.ge.f32.partialorder %v215_v8, 0.0  ;;  %v219_v9 = vmul.f32 0.2, %v215_v8 }
  0x9d   : > { %v220_v10 = vsel %vm218_vm1, %v215_v8, %v219_v9 }
  0x9e   : > { %v221_v11 = vpack.c.bf16 %v220_v10, %v220_v10 }
  0xa0   : > { %223 = vst.msk [vmem:[%s168_s25] sm:$0xf] %vm222_vm2, %v221_v11  ;;  %v216_v12 = vpop.f32.mrf.mxu0 }
  0xa1 PF: > { %s13_s12 = sadd.s32 1, %s319_s12  }
  0xa2   : > { %p10_p4 = scmp.ge.s32.totalorder %s13_s12, 4  }
  0xa4   :  { %12 = sbr.rel (!%p10_p4) target bundleno = 1 (0x1), region = 62 }

// kernel: run.6
= control target key start
LH: loop header
LB: loop body
LE: loop exit
PB: predicated region body
PF: predicated region fallthrough
CT: control target
= control target key end

     0   :  { %s485_s12 = smov 0   ;;  %s515_s0 = inlined_call_operand.vmem [shape: bf16[2,128,25], index: 0, kind: input, shape index: {}]   ;;  %s516_s1 = inlined_call_operand.vmem [shape: bf16[16,128], index: 1, kind: input, shape index: {}]   ;;  %s517_s2 = inlined_call_operand.vmem [shape: f32[16,1], index: 2, kind: input, shape index: {}]   ;;  %s518_s3 = inlined_call_operand.vmem [shape: bf16[2,16,25], index: 3, kind: output, shape index: {}]  }
   0x1 LB: > { %s384_s13 = sadd.s32 4294967295, %s462_s12   ;;  %p388_p0 = scmp.ge.s32.totalorder %s462_s12, 1  ;;  %s462_s12 = sphi %s485_s12, %s13_s12  }
   0x2   : > { %p137_p1 = scmp.lt.s32.totalorder %s462_s12, 3 }
   0x4   : > { %p138_p2 = pnand %p388_p0, %p137_p1 }
   0x5   : > { %p161_p3 = scmp.lt.s32.totalorder (!%p138_p2), %s384_s13, 1 }
   0x6   : > { %141 = sbr.rel (%p138_p2) target bundleno = 333 (0x14d), region = 32 }
   0xb   : > { %s520_s13 = smov (!%p161_p3, %s384_s13), 1  ;;  %v464_v2 = vmov 0   ;;  %v189_v3 = vld [vmem:[%s517_s2] sm:$0xff]  ;;  %v190_v5 = vld [vmem:[%s517_s2 + $0x8] sm:$0xff]  ;;  %vm269_vm0 = vcmask 203776   ;;  %vm326_vm6 = vcmask 199680  }
   0xc   : > { %s431_s14 = sshll.u32 %s520_s13, 6  ;;  %451 = vset.pattern.permute.xlu0 %v464_v2  ;;  %v441_v11 = vld [vmem:[%s516_s1] sm:$0xff]  ;;  %s432_s24 = sshll.u32 %s520_s13, 3 }
   0xd   : > { %s165_s17 = scalar_lea.vmem %s515_s0, %s431_s14  ;;  %193 = vperm.xlu0 %451, %v189_v3   ;;  %s170_s27 = scalar_lea.vmem %s518_s3, %s432_s24 }
   0xe   : > { %v440_v0 = vld [vmem:[%s165_s17 + $0x38] sm:$0xff]  ;;  %v439_v1 = vld [vmem:[%s165_s17 + $0x30] sm:$0xff]  ;;  %v438_v4 = vld [vmem:[%s165_s17 + $0x28] sm:$0xff] }
   0xf   : > { %255 = vmatpush.bf16.msra.mxu0 %v440_v0  ;;  %v437_v6 = vld [vmem:[%s165_s17 + $0x20] sm:$0xff]  ;;  %v436_v7 = vld [vmem:[%s165_s17 + $0x18] sm:$0xff]  ;;  %v435_v8 = vld [vmem:[%s165_s17 + $0x10] sm:$0xff] }
  0x10   : > { %v434_v9 = vld [vmem:[%s165_s17 + $0x8] sm:$0xff]  ;;  %v433_v10 = vld [vmem:[%s165_s17] sm:$0xff] }
  0x13   : > { %256 = vmatpush.bf16.msra.mxu0 %v439_v1 }
  0x15   : > { %198 = vperm.xlu0 %451, %v190_v5  }
  0x17   : > { %257 = vmatpush.bf16.msra.mxu0 %v438_v4 }
  0x1b   : > { %258 = vmatpush.bf16.msra.mxu0 %v437_v6 }
  0x1f   : > { %259 = vmatpush.bf16.msra.mxu0 %v436_v7 }
  0x23   : > { %260 = vmatpush.bf16.msra.mxu0 %v435_v8 }
  0x27   : > { %261 = vmatpush.bf16.msra.mxu0 %v434_v9 }
  0x2b   : > { %262 = vmatpush.bf16.msra.mxu0 %v433_v10 }
  0x2e   : > { %263 = vmatmul.bf16.vlgmr.msra.gmra.mxu0 %v441_v11 }
  0x7f   : > { %v194_v12 = vpop.permute.xlu0 %193 }
  0x87   : > { %v199_v18 = vpop.permute.xlu0 %198 }
  0xab   : > { %v264_v13 = vpop.f32.mrf.mxu0 }
  0xac   : > { %v265_v14 = vadd.f32 %v264_v13, %v194_v12 }
  0xae   : > { %v270_v15 = vsel %vm269_vm0, %v265_v14, 0.0  ;;  %v276_v16 = vmul.f32 %v265_v14, %v265_v14 }
  0xaf   : > { %271 = vadd.xlane.f32.xlu1 %v270_v15 }
  0xb0   : > { %v278_v17 = vsel %vm269_vm0, %v276_v16, 0.0 }
  0xb1   : > { %279 = vadd.xlane.f32.xlu2 %v278_v17 }
  0xb3   : > { %v266_v19 = vpop.f32.mrf.mxu0 }
  0xb4   : > { %v267_v20 = vadd.f32 %v266_v19, %v199_v18 }
  0xb6   : > { %v273_v21 = vsel %vm269_vm0, %v267_v20, 0.0  ;;  %v277_v22 = vmul.f32 %v267_v20, %v267_v20 }
  0xb7   : > { %274 = vadd.xlane.f32.xlu1 %v273_v21 }
  0xb8   : > { %v281_v23 = vsel %vm269_vm0, %v277_v22, 0.0 }
  0xb9   : > { %282 = vadd.xlane.f32.xlu2 %v281_v23 }
 0x122   : > { %v272_v24 = vpop.xlane.xlu1 %271 }
 0x123   : > { %v284_v25 = vmul.f32 0.04, %v272_v24 }
 0x124   : > { %v280_v26 = vpop.xlane.xlu2 %279 }
 0x125   : > { %v288_v27 = vmul.f32 %v284_v25, %v284_v25  ;;  %v286_v28 = vmul.f32 0.04, %v280_v26  ;;  %v292_v46 = vsub.f32 %v265_v14, %v284_v25 }
 0x127   : > { %v290_v29 = vsub.f32 %v286_v28, %v288_v27 }
 0x129   : > { %v294_v30 = vadd.f32 1e-05, %v290_v29 }
 0x12a   : > { %v275_v31 = vpop.xlane.xlu1 %274 }
 0x12b   : > { %452 = vrsqrt.f32 %v294_v30  ;;  %v285_v32 = vmul.f32 0.04, %v275_v31  ;;  %vm302_vm2 = vweird.f32 %v294_v30 }
 0x12c   : > { %v283_v33 = vpop.xlane.xlu2 %282 }
 0x12d   : > { %v289_v34 = vmul.f32 %v285_v32, %v285_v32  ;;  %v287_v35 = vmul.f32 0.04, %v283_v33  ;;  %v293_v56 = vsub.f32 %v267_v20, %v285_v32 }
 0x12f   : > { %v291_v36 = vsub.f32 %v287_v35, %v289_v34 }
 0x131   : > { %v453_v37 = vpop.eup %452  ;;  %v295_v38 = vadd.f32 1e-05, %v291_v36 }
 0x132   : > { %v297_v39 = vmul.f32 %v453_v37, %v294_v30  ;;  %vm303_vm1 = vweird.f32 %v453_v37 }
 0x133   : > { %454 = vrsqrt.f32 %v295_v38  ;;  %vm304_vm3 = vmor %vm302_vm2, %vm303_vm1  ;;  %vm312_vm7 = vweird.f32 %v295_v38 }
 0x134   : > { %v298_v40 = vmul.f32 %v453_v37, %v297_v39 }
 0x136   : > { %v299_v41 = vmul.f32 0.5, %v298_v40 }
 0x138   : > { %v300_v42 = vsub.f32 1.5, %v299_v41 }
 0x139   : > { %v455_v43 = vpop.eup %454 }
 0x13a   : > { %v301_v44 = vmul.f32 %v453_v37, %v300_v42  ;;  %v307_v45 = vmul.f32 %v455_v43, %v295_v38  ;;  %vm313_vm5 = vweird.f32 %v455_v43 }
 0x13b   : > { %vm314_vm8 = vmor %vm312_vm7, %vm313_vm5 }
 0x13c   : > { %v305_v47 = vsel %vm304_vm3, %v453_v37, %v301_v44  ;;  %v308_v48 = vmul.f32 %v455_v43, %v307_v45 }
 0x13d   : > { %v316_v49 = vmul.f32 %v305_v47, %v292_v46 }
 0x13e   : > { %v309_v50 = vmul.f32 0.5, %v308_v48 }
 0x13f   : > { %vm318_vm4 = vcmp.ge.f32.partialorder %v316_v49, 0.0  ;;  %v320_v51 = vmul.f32 0.2, %v316_v49 }
 0x140   : > { %v310_v52 = vsub.f32 1.5, %v309_v50 }
 0x141   : > { %v322_v53 = vsel %vm318_vm4, %v316_v49, %v320_v51 }
 0x142   : > { %v324_v54 = vpack.c.bf16 %v322_v53, %v322_v53  ;;  %v311_v55 = vmul.f32 %v455_v43, %v310_v52 }
 0x144   : > { %327 = vst.msk [vmem:[%s170_s27] sm:$0xf] %vm326_vm6, %v324_v54  ;;  %v315_v57 = vsel %vm314_vm8, %v455_v43, %v311_v55 }
 0x145   : > { %v317_v58 = vmul.f32 %v315_v57, %v293_v56 }
 0x147   : > { %vm319_vm9 = vcmp.ge.f32.partialorder %v317_v58, 0.0  ;;  %v321_v59 = vmul.f32 0.2, %v317_v58 }
 0x149   : > { %v323_v60 = vsel %vm319_vm9, %v317_v58, %v321_v59 }
 0x14a   : > { %v325_v61 = vpack.c.bf16 %v323_v60, %v323_v60 }
 0x14c   : > { %328 = vst.msk [vmem:[%s170_s27 + $0x4] sm:$0xf] %vm326_vm6, %v325_v61 }
 0x14d PF: > { %s13_s12 = sadd.s32 1, %s462_s12  }
 0x14e   : > { %p10_p4 = scmp.ge.s32.totalorder %s13_s12, 4  }
 0x150   :  { %12 = sbr.rel (!%p10_p4) target bundleno = 1 (0x1), region = 62 }

// kernel: run.7
= control target key start
LH: loop header
LB: loop body
LE: loop exit
PB: predicated region body
PF: predicated region fallthrough
CT: control target
= control target key end

     0   :  { %s735_s12 = smov 0   ;;  %s862_s0 = inlined_call_operand.vmem [shape: bf16[2,256,9], index: 0, kind: input, shape index: {}]   ;;  %s863_s1 = inlined_call_operand.vmem [shape: bf16[32,256], index: 1, kind: input, shape index: {}]   ;;  %s864_s2 = inlined_call_operand.vmem [shape: f32[32,1], index: 2, kind: input, shape index: {}]   ;;  %s865_s3 = inlined_call_operand.vmem [shape: bf16[2,32,9], index: 3, kind: output, shape index: {}]  }
   0x1 LB: > { %s558_s13 = sadd.s32 4294967295, %s712_s12   ;;  %p562_p0 = scmp.ge.s32.totalorder %s712_s12, 1  ;;  %s712_s12 = sphi %s735_s12, %s13_s12  }
   0x2   : > { %p137_p1 = scmp.lt.s32.totalorder %s712_s12, 3 }
   0x4   : > { %p138_p2 = pnand %p562_p0, %p137_p1 }
   0x5   : > { %p161_p3 = scmp.lt.s32.totalorder (!%p138_p2), %s558_s13, 1 }
   0x6   : > { %141 = sbr.rel (%p138_p2) target bundleno = 365 (0x16d), region = 32 }
   0xb   : > { %s867_s13 = smov (!%p161_p3, %s558_s13), 1  ;;  %v714_v4 = vmov 0   ;;  %v207_v7 = vld [vmem:[%s864_s2] sm:$0xff]  ;;  %v209_v8 = vld [vmem:[%s864_s2 + $0x10] sm:$0xff]  ;;  %v208_v11 = vld [vmem:[%s864_s2 + $0x8] sm:$0xff]  ;;  %vm385_vm0 = vcmask 72704  }
   0xc   : > { %s649_s14 = sshll.u32 %s867_s13, 7  ;;  %696 = vset.pattern.permute.xlu0 %v714_v4  ;;  %697 = vset.pattern.permute.xlu1 %v714_v4  ;;  %v210_v12 = vld [vmem:[%s864_s2 + $0x18] sm:$0xff]  ;;  %v569_v19 = vld [vmem:[%s863_s1] sm:$0xf]  ;;  %v668_v21 = vld [vmem:[%s863_s1 + $0x4] sm:$0xf0] }
   0xd   : > { %s749_s17 = scalar_lea.vmem %s862_s0, %s649_s14  ;;  %213 = vperm.xlu0 %696, %v207_v7   ;;  %223 = vperm.xlu1 %697, %v209_v8   ;;  %v577_v22 = vld [vmem:[%s863_s1 + $0x10] sm:$0xf]  ;;  %v670_v24 = vld [vmem:[%s863_s1 + $0x14] sm:$0xf0]  ;;  %v667_v25 = vld [vmem:[%s863_s1 + $0x4] sm:$0xf]  ;;  %v570_v29 = vor.u32 %v668_v21, %v569_v19 }
   0xe   : > { %v658_v0 = vld [vmem:[%s749_s17 + $0x38] sm:$0xff]  ;;  %v657_v2 = vld [vmem:[%s749_s17 + $0x30] sm:$0xff]  ;;  %v656_v5 = vld [vmem:[%s749_s17 + $0x28] sm:$0xff]  ;;  %v578_v30 = vor.u32 %v670_v24, %v577_v22  ;;  %vm498_vm6 = vcmask 68608  }
   0xf   : > { %v666_v1 = vld [vmem:[%s749_s17 + $0x78] sm:$0xff]  ;;  %347 = vmatpush.bf16.msra.mxu0 %v658_v0  ;;  %671 = vmatpush.bf16.msra.mxu2 %v658_v0  ;;  %v665_v3 = vld [vmem:[%s749_s17 + $0x70] sm:$0xff]  ;;  %v664_v6 = vld [vmem:[%s749_s17 + $0x68] sm:$0xff] }
  0x10   : > { %366 = vmatpush.bf16.msra.mxu1 %v666_v1  ;;  %679 = vmatpush.bf16.msra.mxu3 %v666_v1  ;;  %v655_v9 = vld [vmem:[%s749_s17 + $0x20] sm:$0xff]  ;;  %v654_v13 = vld [vmem:[%s749_s17 + $0x18] sm:$0xff]  ;;  %v653_v15 = vld [vmem:[%s749_s17 + $0x10] sm:$0xff] }
  0x11   : > { %v663_v10 = vld [vmem:[%s749_s17 + $0x60] sm:$0xff]  ;;  %v662_v14 = vld [vmem:[%s749_s17 + $0x58] sm:$0xff]  ;;  %v661_v16 = vld [vmem:[%s749_s17 + $0x50] sm:$0xff] }
  0x12   : > { %v652_v17 = vld [vmem:[%s749_s17 + $0x8] sm:$0xff]  ;;  %v651_v20 = vld [vmem:[%s749_s17] sm:$0xff]  ;;  %v669_v27 = vld [vmem:[%s863_s1 + $0x14] sm:$0xf] }
  0x13   : > { %348 = vmatpush.bf16.msra.mxu0 %v657_v2  ;;  %672 = vmatpush.bf16.msra.mxu2 %v657_v2  ;;  %v660_v18 = vld [vmem:[%s749_s17 + $0x48] sm:$0xff]  ;;  %v659_v23 = vld [vmem:[%s749_s17 + $0x40] sm:$0xff]  ;;  %v579_v28 = vld [vmem:[%s863_s1 + $0x18] sm:$0xf0]  ;;  %s650_s17 = sshll.u32 %s867_s13, 4 }
  0x14   : > { %367 = vmatpush.bf16.msra.mxu1 %v665_v3  ;;  %680 = vmatpush.bf16.msra.mxu3 %v665_v3  ;;  %v571_v26 = vld [vmem:[%s863_s1 + $0x8] sm:$0xf0]  ;;  %v582_v32 = vor.u32 %v669_v27, %v579_v28  ;;  %s844_s20 = scalar_lea.vmem %s865_s3, %s650_s17 }
  0x15   : > { %218 = vperm.xlu0 %696, %v208_v11   ;;  %228 = vperm.xlu1 %697, %v210_v12   ;;  %v574_v31 = vor.u32 %v667_v25, %v571_v26 }
  0x17   : > { %349 = vmatpush.bf16.msra.mxu0 %v656_v5  ;;  %673 = vmatpush.bf16.msra.mxu2 %v656_v5 }
  0x18   : > { %368 = vmatpush.bf16.msra.mxu1 %v664_v6  ;;  %681 = vmatpush.bf16.msra.mxu3 %v664_v6 }
  0x1b   : > { %350 = vmatpush.bf16.msra.mxu0 %v655_v9  ;;  %674 = vmatpush.bf16.msra.mxu2 %v655_v9 }
  0x1c   : > { %369 = vmatpush.bf16.msra.mxu1 %v663_v10  ;;  %682 = vmatpush.bf16.msra.mxu3 %v663_v10 }
  0x1f   : > { %351 = vmatpush.bf16.msra.mxu0 %v654_v13  ;;  %675 = vmatpush.bf16.msra.mxu2 %v654_v13 }
  0x20   : > { %370 = vmatpush.bf16.msra.mxu1 %v662_v14  ;;  %683 = vmatpush.bf16.msra.mxu3 %v662_v14 }
  0x23   : > { %352 = vmatpush.bf16.msra.mxu0 %v653_v15  ;;  %676 = vmatpush.bf16.msra.mxu2 %v653_v15 }
  0x24   : > { %371 = vmatpush.bf16.msra.mxu1 %v661_v16  ;;  %684 = vmatpush.bf16.msra.mxu3 %v661_v16 }
  0x27   : > { %353 = vmatpush.bf16.msra.mxu0 %v652_v17  ;;  %677 = vmatpush.bf16.msra.mxu2 %v652_v17 }
  0x28   : > { %372 = vmatpush.bf16.msra.mxu1 %v660_v18  ;;  %685 = vmatpush.bf16.msra.mxu3 %v660_v18 }
  0x2b   : > { %354 = vmatpush.bf16.msra.mxu0 %v651_v20  ;;  %678 = vmatpush.bf16.msra.mxu2 %v651_v20 }
  0x2c   : > { %373 = vmatpush.bf16.msra.mxu1 %v659_v23  ;;  %686 = vmatpush.bf16.msra.mxu3 %v659_v23 }
  0x2e   : > { %355 = vmatmul.bf16.vlgmr.msra.gmra.mxu0 %v570_v29  ;;  %360 = vmatmul.bf16.vlgmr.msra.gmra.mxu2 %v578_v30 }
  0x2f   : > { %374 = vmatmul.bf16.vlgmr.msra.gmra.mxu1 %v574_v31  ;;  %379 = vmatmul.bf16.vlgmr.msra.gmra.mxu3 %v582_v32 }
  0x7f   : > { %v214_v33 = vpop.permute.xlu0 %213  ;;  %v224_v37 = vpop.permute.xlu1 %223 }
  0x87   : > { %v219_v43 = vpop.permute.xlu0 %218  ;;  %v229_v50 = vpop.permute.xlu1 %228 }
  0xab   : > { %v356_v34 = vpop.f32.mrf.mxu0 }
  0xac   : > { %v357_v35 = vadd.f32 %v356_v34, %v214_v33  ;;  %v375_v36 = vpop.f32.mrf.mxu1 }
  0xae   : > { %v803_v38 = vadd.f32 %v375_v36, %v357_v35 }
  0xb0   : > { %v386_v39 = vsel %vm385_vm0, %v803_v38, 0.0  ;;  %v398_v56 = vmul.f32 %v803_v38, %v803_v38 }
  0xb1   : > { %v361_v40 = vpop.f32.mrf.mxu2  ;;  %387 = vadd.xlane.f32.xlu2 %v386_v39 }
  0xb2   : > { %v362_v41 = vadd.f32 %v361_v40, %v224_v37  ;;  %v380_v42 = vpop.f32.mrf.mxu3  ;;  %v402_v58 = vsel %vm385_vm0, %v398_v56, 0.0 }
  0xb3   : > { %v358_v44 = vpop.f32.mrf.mxu0 }
  0xb4   : > { %v359_v45 = vadd.f32 %v358_v44, %v219_v43  ;;  %v807_v46 = vadd.f32 %v380_v42, %v362_v41  ;;  %v377_v47 = vpop.f32.mrf.mxu1 }
  0xb6   : > { %v809_v48 = vadd.f32 %v377_v47, %v359_v45  ;;  %v392_v49 = vsel %vm385_vm0, %v807_v46, 0.0  ;;  %v400_v61 = vmul.f32 %v807_v46, %v807_v46 }
  0xb7   : > { %393 = vadd.xlane.f32.xlu0 %v392_v49 }
  0xb8   : > { %v389_v51 = vsel %vm385_vm0, %v809_v48, 0.0  ;;  %v399_v59 = vmul.f32 %v809_v48, %v809_v48  ;;  %v408_v62 = vsel %vm385_vm0, %v400_v61, 0.0 }
  0xb9   : > { %v363_v52 = vpop.f32.mrf.mxu2  ;;  %390 = vadd.xlane.f32.xlu2 %v389_v51 }
  0xba   : > { %v364_v53 = vadd.f32 %v363_v52, %v229_v50  ;;  %v382_v54 = vpop.f32.mrf.mxu3  ;;  %v405_v60 = vsel %vm385_vm0, %v399_v59, 0.0 }
  0xbc   : > { %v815_v55 = vadd.f32 %v382_v54, %v364_v53 }
  0xbe   : > { %v395_v57 = vsel %vm385_vm0, %v815_v55, 0.0  ;;  %v401_v63 = vmul.f32 %v815_v55, %v815_v55 }
  0xbf   : > { %396 = vadd.xlane.f32.xlu1 %v395_v57 }
  0xc0   : > { %v411_v0 = vsel %vm385_vm0, %v401_v63, 0.0 }
  0xc1   : > { %403 = vadd.xlane.f32.xlu2 %v402_v58 }
  0xc9   : > { %406 = vadd.xlane.f32.xlu2 %v405_v60 }
  0xd1   : > { %409 = vadd.xlane.f32.xlu2 %v408_v62 }
  0xd9   : > { %412 = vadd.xlane.f32.xlu2 %v411_v0 }
 0x124   : > { %v388_v1 = vpop.xlane.xlu2 %387 }
 0x125   : > { %v414_v3 = vmul.f32 0.11111111, %v388_v1 }
 0x127   : > { %v422_v5 = vmul.f32 %v414_v3, %v414_v3  ;;  %v430_v31 = vsub.f32 %v803_v38, %v414_v3 }
 0x12a   : > { %v394_v13 = vpop.xlane.xlu0 %393 }
 0x12b   : > { %v831_v16 = vmul.f32 0.11111111, %v394_v13 }
 0x12c   : > { %v391_v2 = vpop.xlane.xlu2 %390 }
 0x12d   : > { %v415_v8 = vmul.f32 0.11111111, %v391_v2  ;;  %v424_v19 = vmul.f32 %v831_v16, %v831_v16 }
 0x12f   : > { %v423_v11 = vmul.f32 %v415_v8, %v415_v8  ;;  %v431_v51 = vsub.f32 %v809_v48, %v415_v8  ;;  %v432_v48 = vsub.f32 %v807_v46, %v831_v16 }
 0x132   : > { %v397_v25 = vpop.xlane.xlu1 %396 }
 0x133   : > { %v836_v32 = vmul.f32 0.11111111, %v397_v25 }
 0x134   : > { %v404_v4 = vpop.xlane.xlu2 %403 }
 0x135   : > { %v418_v6 = vmul.f32 0.11111111, %v404_v4  ;;  %v425_v36 = vmul.f32 %v836_v32, %v836_v32  ;;  %v433_v46 = vsub.f32 %v815_v55, %v836_v32 }
 0x137   : > { %v426_v7 = vsub.f32 %v418_v6, %v422_v5 }
 0x139   : > { %v434_v9 = vadd.f32 1e-05, %v426_v7 }
 0x13b   : > { %698 = vrsqrt.f32 %v434_v9  ;;  %vm444_vm2 = vweird.f32 %v434_v9 }
 0x13c   : > { %v407_v10 = vpop.xlane.xlu2 %406 }
 0x13d   : > { %v419_v12 = vmul.f32 0.11111111, %v407_v10 }
 0x13f   : > { %v427_v14 = vsub.f32 %v419_v12, %v423_v11 }
 0x141   : > { %v699_v15 = vpop.eup %698  ;;  %v435_v17 = vadd.f32 1e-05, %v427_v14 }
 0x142   : > { %v439_v18 = vmul.f32 %v699_v15, %v434_v9  ;;  %vm445_vm1 = vweird.f32 %v699_v15 }
 0x143   : > { %700 = vrsqrt.f32 %v435_v17  ;;  %vm446_vm3 = vmor %vm444_vm2, %vm445_vm1  ;;  %vm454_vm7 = vweird.f32 %v435_v17 }
 0x144   : > { %v440_v20 = vmul.f32 %v699_v15, %v439_v18  ;;  %v410_v21 = vpop.xlane.xlu2 %409 }
 0x145   : > { %v420_v22 = vmul.f32 0.11111111, %v410_v21 }
 0x146   : > { %v441_v23 = vmul.f32 0.5, %v440_v20 }
 0x147   : > { %v428_v24 = vsub.f32 %v420_v22, %v424_v19 }
 0x148   : > { %v442_v26 = vsub.f32 1.5, %v441_v23 }
 0x149   : > { %v701_v27 = vpop.eup %700  ;;  %v436_v28 = vadd.f32 1e-05, %v428_v24 }
 0x14a   : > { %v443_v29 = vmul.f32 %v699_v15, %v442_v26  ;;  %v449_v30 = vmul.f32 %v701_v27, %v435_v17  ;;  %vm455_vm5 = vweird.f32 %v701_v27 }
 0x14b   : > { %702 = vrsqrt.f32 %v436_v28  ;;  %vm456_vm8 = vmor %vm454_vm7, %vm455_vm5  ;;  %vm464_vm11 = vweird.f32 %v436_v28 }
 0x14c   : > { %v447_v33 = vsel %vm446_vm3, %v699_v15, %v443_v29  ;;  %v450_v34 = vmul.f32 %v701_v27, %v449_v30  ;;  %v413_v35 = vpop.xlane.xlu2 %412 }
 0x14d   : > { %v478_v37 = vmul.f32 %v447_v33, %v430_v31  ;;  %v421_v39 = vmul.f32 0.11111111, %v413_v35 }
 0x14e   : > { %v451_v40 = vmul.f32 0.5, %v450_v34 }
 0x14f   : > { %vm482_vm4 = vcmp.ge.f32.partialorder %v478_v37, 0.0  ;;  %v486_v41 = vmul.f32 0.2, %v478_v37  ;;  %v429_v42 = vsub.f32 %v421_v39, %v425_v36 }
 0x150   : > { %v452_v43 = vsub.f32 1.5, %v451_v40 }
 0x151   : > { %v703_v38 = vpop.eup %702  ;;  %v490_v44 = vsel %vm482_vm4, %v478_v37, %v486_v41  ;;  %v437_v45 = vadd.f32 1e-05, %v429_v42 }
 0x152   : > { %v494_v47 = vpack.c.bf16 %v490_v44, %v490_v44  ;;  %v453_v49 = vmul.f32 %v701_v27, %v452_v43  ;;  %v459_v50 = vmul.f32 %v703_v38, %v436_v28  ;;  %vm465_vm10 = vweird.f32 %v703_v38 }
 0x153   : > { %704 = vrsqrt.f32 %v437_v45  ;;  %vm466_vm12 = vmor %vm464_vm11, %vm465_vm10  ;;  %vm474_vm15 = vweird.f32 %v437_v45 }
 0x154   : > { %499 = vst.msk [vmem:[%s844_s20] sm:$0xf] %vm498_vm6, %v494_v47  ;;  %v457_v52 = vsel %vm456_vm8, %v701_v27, %v453_v49  ;;  %v460_v53 = vmul.f32 %v703_v38, %v459_v50 }
 0x155   : > { %v479_v54 = vmul.f32 %v457_v52, %v431_v51 }
 0x156   : > { %v461_v56 = vmul.f32 0.5, %v460_v53 }
 0x157   : > { %vm483_vm9 = vcmp.ge.f32.partialorder %v479_v54, 0.0  ;;  %v487_v57 = vmul.f32 0.2, %v479_v54 }
 0x158   : > { %v462_v58 = vsub.f32 1.5, %v461_v56 }
 0x159   : > { %v705_v59 = vpop.eup %704  ;;  %v491_v60 = vsel %vm483_vm9, %v479_v54, %v487_v57 }
 0x15a   : > { %v495_v61 = vpack.c.bf16 %v491_v60, %v491_v60  ;;  %v463_v62 = vmul.f32 %v703_v38, %v462_v58  ;;  %v469_v63 = vmul.f32 %v705_v59, %v437_v45  ;;  %vm475_vm14 = vweird.f32 %v705_v59 }
 0x15b   : > { %vm476_vm0 = vmor %vm474_vm15, %vm475_vm14 }
 0x15c   : > { %500 = vst.msk [vmem:[%s844_s20 + $0x4] sm:$0xf] %vm498_vm6, %v495_v61  ;;  %v467_v0 = vsel %vm466_vm12, %v703_v38, %v463_v62  ;;  %v470_v1 = vmul.f32 %v705_v59, %v469_v63 }
 0x15d   : > { %v480_v2 = vmul.f32 %v467_v0, %v432_v48 }
 0x15e   : > { %v471_v3 = vmul.f32 0.5, %v470_v1 }
 0x15f   : > { %vm484_vm13 = vcmp.ge.f32.partialorder %v480_v2, 0.0  ;;  %v488_v4 = vmul.f32 0.2, %v480_v2 }
 0x160   : > { %v472_v5 = vsub.f32 1.5, %v471_v3 }
 0x161   : > { %v492_v6 = vsel %vm484_vm13, %v480_v2, %v488_v4 }
 0x162   : > { %v496_v7 = vpack.c.bf16 %v492_v6, %v492_v6  ;;  %v473_v8 = vmul.f32 %v705_v59, %v472_v5 }
 0x164   : > { %501 = vst.msk [vmem:[%s844_s20 + $0x8] sm:$0xf] %vm498_vm6, %v496_v7  ;;  %v477_v9 = vsel %vm476_vm0, %v705_v59, %v473_v8 }
 0x165   : > { %v481_v10 = vmul.f32 %v477_v9, %v433_v46 }
 0x167   : > { %vm485_vm1 = vcmp.ge.f32.partialorder %v481_v10, 0.0  ;;  %v489_v11 = vmul.f32 0.2, %v481_v10 }
 0x169   : > { %v493_v12 = vsel %vm485_vm1, %v481_v10, %v489_v11 }
 0x16a   : > { %v497_v13 = vpack.c.bf16 %v493_v12, %v493_v12 }
 0x16c   : > { %502 = vst.msk [vmem:[%s844_s20 + $0xc] sm:$0xf] %vm498_vm6, %v497_v13 }
 0x16d PF: > { %s13_s12 = sadd.s32 1, %s712_s12  }
 0x16e   : > { %p10_p4 = scmp.ge.s32.totalorder %s13_s12, 4  }
 0x170   :  { %12 = sbr.rel (!%p10_p4) target bundleno = 1 (0x1), region = 62 }

// kernel: run.8
= control target key start
LH: loop header
LB: loop body
LE: loop exit
PB: predicated region body
PF: predicated region fallthrough
CT: control target
= control target key end

     0   :  { %s1009_s12 = smov 0   ;;  %s1171_s0 = inlined_call_operand.vmem [shape: bf16[2,512,16], index: 0, kind: input, shape index: {}]   ;;  %s1172_s1 = inlined_call_operand.vmem [shape: bf16[32,512], index: 1, kind: input, shape index: {}]   ;;  %s1173_s2 = inlined_call_operand.vmem [shape: f32[32,1], index: 2, kind: input, shape index: {}]   ;;  %s1174_s3 = inlined_call_operand.vmem [shape: bf16[2,32,16], index: 3, kind: output, shape index: {}]  }
   0x1 LB: > { %s748_s13 = sadd.s32 4294967295, %s986_s12   ;;  %p752_p0 = scmp.ge.s32.totalorder %s986_s12, 1  ;;  %s986_s12 = sphi %s1009_s12, %s13_s12  }
   0x2   : > { %p137_p1 = scmp.lt.s32.totalorder %s986_s12, 3 }
   0x4   : > { %p138_p2 = pnand %p752_p0, %p137_p1 }
   0x5   : > { %p161_p3 = scmp.lt.s32.totalorder (!%p138_p2), %s748_s13, 1 }
   0x6   : > { %141 = sbr.rel (%p138_p2) target bundleno = 373 (0x175), region = 32 }
   0xb   : > { %s1176_s13 = smov (!%p161_p3, %s748_s13), 1  ;;  %v988_v8 = vmov 0   ;;  %v243_v17 = vld [vmem:[%s1173_s2] sm:$0xff]  ;;  %v244_v24 = vld [vmem:[%s1173_s2 + $0x8] sm:$0xff]  ;;  %v245_v27 = vld [vmem:[%s1173_s2 + $0x10] sm:$0xff]  ;;  %vm575_vm0 = vcmask 130048  }
   0xc   : > { %s919_s14 = sshll.u32 %s1176_s13, 8  ;;  %970 = vset.pattern.permute.xlu0 %v988_v8  ;;  %971 = vset.pattern.permute.xlu1 %v988_v8  ;;  %v759_v33 = vld [vmem:[%s1172_s1] sm:$0xf]  ;;  %v955_v34 = vld [vmem:[%s1172_s1 + $0xc] sm:$0xf0]  ;;  %v246_v38 = vld [vmem:[%s1173_s2 + $0x18] sm:$0xff] }
   0xd   : > { %s1023_s17 = scalar_lea.vmem %s1171_s0, %s919_s14  ;;  %249 = vperm.xlu0 %970, %v243_v17   ;;  %259 = vperm.xlu1 %971, %v245_v27   ;;  %v953_v35 = vld [vmem:[%s1172_s1 + $0x4] sm:$0xf]  ;;  %v761_v40 = vld [vmem:[%s1172_s1 + $0x10] sm:$0xf0]  ;;  %v767_v41 = vld [vmem:[%s1172_s1 + $0x8] sm:$0xf]  ;;  %v760_v45 = vor.u32 %v955_v34, %v759_v33 }
   0xe   : > { %v928_v0 = vld [vmem:[%s1023_s17 + $0x38] sm:$0xff]  ;;  %v927_v4 = vld [vmem:[%s1023_s17 + $0x30] sm:$0xff]  ;;  %v926_v9 = vld [vmem:[%s1023_s17 + $0x28] sm:$0xff]  ;;  %v764_v46 = vor.u32 %v953_v35, %v761_v40  ;;  %s920_s6 = sshll.u32 %s1176_s13, 4  ;;  %vm688_vm6 = vcmask 125952  }
   0xf   : > { %v936_v1 = vld [vmem:[%s1023_s17 + $0x78] sm:$0xff]  ;;  %499 = vmatpush.bf16.msra.mxu0 %v928_v0  ;;  %v935_v5 = vld [vmem:[%s1023_s17 + $0x70] sm:$0xff]  ;;  %v934_v10 = vld [vmem:[%s1023_s17 + $0x68] sm:$0xff]  ;;  %s1154_s9 = scalar_lea.vmem %s1174_s3, %s920_s6 }
  0x10   : > { %v944_v2 = vld [vmem:[%s1023_s17 + $0xb8] sm:$0xff]  ;;  %518 = vmatpush.bf16.msra.mxu1 %v936_v1  ;;  %v943_v6 = vld [vmem:[%s1023_s17 + $0xb0] sm:$0xff]  ;;  %v942_v11 = vld [vmem:[%s1023_s17 + $0xa8] sm:$0xff] }
  0x11   : > { %v952_v3 = vld [vmem:[%s1023_s17 + $0xf8] sm:$0xff]  ;;  %537 = vmatpush.bf16.msra.mxu2 %v944_v2  ;;  %v951_v7 = vld [vmem:[%s1023_s17 + $0xf0] sm:$0xff]  ;;  %v950_v12 = vld [vmem:[%s1023_s17 + $0xe8] sm:$0xff] }
  0x12   : > { %556 = vmatpush.bf16.msra.mxu3 %v952_v3  ;;  %v925_v13 = vld [vmem:[%s1023_s17 + $0x20] sm:$0xff]  ;;  %v924_v18 = vld [vmem:[%s1023_s17 + $0x18] sm:$0xff]  ;;  %v923_v22 = vld [vmem:[%s1023_s17 + $0x10] sm:$0xff] }
  0x13   : > { %500 = vmatpush.bf16.msra.mxu0 %v927_v4  ;;  %v933_v14 = vld [vmem:[%s1023_s17 + $0x60] sm:$0xff]  ;;  %v932_v19 = vld [vmem:[%s1023_s17 + $0x58] sm:$0xff]  ;;  %v931_v23 = vld [vmem:[%s1023_s17 + $0x50] sm:$0xff] }
  0x14   : > { %519 = vmatpush.bf16.msra.mxu1 %v935_v5  ;;  %v941_v15 = vld [vmem:[%s1023_s17 + $0xa0] sm:$0xff]  ;;  %v940_v20 = vld [vmem:[%s1023_s17 + $0x98] sm:$0xff]  ;;  %v939_v25 = vld [vmem:[%s1023_s17 + $0x90] sm:$0xff] }
  0x15   : > { %538 = vmatpush.bf16.msra.mxu2 %v943_v6  ;;  %v949_v16 = vld [vmem:[%s1023_s17 + $0xe0] sm:$0xff]  ;;  %v948_v21 = vld [vmem:[%s1023_s17 + $0xd8] sm:$0xff]  ;;  %v947_v26 = vld [vmem:[%s1023_s17 + $0xd0] sm:$0xff]  ;;  %254 = vperm.xlu0 %970, %v244_v24  }
  0x16   : > { %557 = vmatpush.bf16.msra.mxu3 %v951_v7  ;;  %v922_v28 = vld [vmem:[%s1023_s17 + $0x8] sm:$0xff]  ;;  %v921_v32 = vld [vmem:[%s1023_s17] sm:$0xff]  ;;  %v956_v42 = vld [vmem:[%s1172_s1 + $0x14] sm:$0xf0]  ;;  %264 = vperm.xlu1 %971, %v246_v38  }
  0x17   : > { %501 = vmatpush.bf16.msra.mxu0 %v926_v9  ;;  %v930_v29 = vld [vmem:[%s1023_s17 + $0x48] sm:$0xff]  ;;  %v929_v36 = vld [vmem:[%s1023_s17 + $0x40] sm:$0xff]  ;;  %v769_v44 = vld [vmem:[%s1172_s1 + $0x18] sm:$0xf0]  ;;  %v768_v47 = vor.u32 %v956_v42, %v767_v41 }
  0x18   : > { %520 = vmatpush.bf16.msra.mxu1 %v934_v10  ;;  %v938_v30 = vld [vmem:[%s1023_s17 + $0x88] sm:$0xff]  ;;  %v937_v37 = vld [vmem:[%s1023_s17 + $0x80] sm:$0xff]  ;;  %v959_v51 = vld [vmem:[%s1172_s1 + $0x2c] sm:$0xf0] }
  0x19   : > { %539 = vmatpush.bf16.msra.mxu2 %v942_v11  ;;  %v946_v31 = vld [vmem:[%s1023_s17 + $0xc8] sm:$0xff]  ;;  %v945_v39 = vld [vmem:[%s1023_s17 + $0xc0] sm:$0xff]  ;;  %v777_v53 = vld [vmem:[%s1172_s1 + $0x30] sm:$0xf0] }
  0x1a   : > { %558 = vmatpush.bf16.msra.mxu3 %v950_v12  ;;  %v954_v43 = vld [vmem:[%s1172_s1 + $0xc] sm:$0xf]  ;;  %v783_v49 = vld [vmem:[%s1172_s1 + $0x28] sm:$0xf]  ;;  %v775_v50 = vld [vmem:[%s1172_s1 + $0x20] sm:$0xf] }
  0x1b   : > { %502 = vmatpush.bf16.msra.mxu0 %v925_v13  ;;  %v772_v48 = vor.u32 %v954_v43, %v769_v44  ;;  %v957_v52 = vld [vmem:[%s1172_s1 + $0x24] sm:$0xf]  ;;  %v960_v54 = vld [vmem:[%s1172_s1 + $0x34] sm:$0xf0]  ;;  %v958_v55 = vld [vmem:[%s1172_s1 + $0x2c] sm:$0xf]  ;;  %v776_v57 = vor.u32 %v959_v51, %v775_v50 }
  0x1c   : > { %521 = vmatpush.bf16.msra.mxu1 %v933_v14  ;;  %v785_v56 = vld [vmem:[%s1172_s1 + $0x38] sm:$0xf0]  ;;  %v780_v58 = vor.u32 %v957_v52, %v777_v53  ;;  %v784_v59 = vor.u32 %v960_v54, %v783_v49 }
  0x1d   : > { %540 = vmatpush.bf16.msra.mxu2 %v941_v15  ;;  %v788_v60 = vor.u32 %v958_v55, %v785_v56 }
  0x1e   : > { %559 = vmatpush.bf16.msra.mxu3 %v949_v16 }
  0x1f   : > { %503 = vmatpush.bf16.msra.mxu0 %v924_v18 }
  0x20   : > { %522 = vmatpush.bf16.msra.mxu1 %v932_v19 }
  0x21   : > { %541 = vmatpush.bf16.msra.mxu2 %v940_v20 }
  0x22   : > { %560 = vmatpush.bf16.msra.mxu3 %v948_v21 }
  0x23   : > { %504 = vmatpush.bf16.msra.mxu0 %v923_v22 }
  0x24   : > { %523 = vmatpush.bf16.msra.mxu1 %v931_v23 }
  0x25   : > { %542 = vmatpush.bf16.msra.mxu2 %v939_v25 }
  0x26   : > { %561 = vmatpush.bf16.msra.mxu3 %v947_v26 }
  0x27   : > { %505 = vmatpush.bf16.msra.mxu0 %v922_v28 }
  0x28   : > { %524 = vmatpush.bf16.msra.mxu1 %v930_v29 }
  0x29   : > { %543 = vmatpush.bf16.msra.mxu2 %v938_v30 }
  0x2a   : > { %562 = vmatpush.bf16.msra.mxu3 %v946_v31 }
  0x2b   : > { %506 = vmatpush.bf16.msra.mxu0 %v921_v32 }
  0x2c   : > { %525 = vmatpush.bf16.msra.mxu1 %v929_v36 }
  0x2d   : > { %544 = vmatpush.bf16.msra.mxu2 %v937_v37 }
  0x2e   : > { %563 = vmatpush.bf16.msra.mxu3 %v945_v39  ;;  %507 = vmatmul.bf16.vlgmr.msra.gmra.mxu0 %v760_v45 }
  0x2f   : > { %526 = vmatmul.bf16.vlgmr.msra.gmra.mxu1 %v764_v46 }
  0x30   : > { %545 = vmatmul.bf16.vlgmr.msra.gmra.mxu2 %v768_v47 }
  0x31   : > { %564 = vmatmul.bf16.vlgmr.msra.gmra.mxu3 %v772_v48 }
  0x3e   : > { %512 = vmatmul.bf16.gmra.mxu0 %v776_v57 }
  0x3f   : > { %531 = vmatmul.bf16.gmra.mxu1 %v780_v58 }
  0x40   : > { %550 = vmatmul.bf16.gmra.mxu2 %v784_v59 }
  0x41   : > { %569 = vmatmul.bf16.gmra.mxu3 %v788_v60 }
  0x7f   : > { %v250_v61 = vpop.permute.xlu0 %249  ;;  %v260_v11 = vpop.permute.xlu1 %259 }
  0x87   : > { %v255_v7 = vpop.permute.xlu0 %254 }
  0x88   : > { %v265_v22 = vpop.permute.xlu1 %264 }
  0xab   : > { %v508_v62 = vpop.f32.mrf.mxu0 }
  0xac   : > { %v527_v63 = vpop.f32.mrf.mxu1  ;;  %v509_v0 = vadd.f32 %v508_v62, %v250_v61 }
  0xae   : > { %v528_v1 = vadd.f32 %v527_v63, %v509_v0 }
  0xb3   : > { %v546_v2 = vpop.f32.mrf.mxu2  ;;  %v510_v5 = vpop.f32.mrf.mxu0 }
  0xb4   : > { %v565_v3 = vpop.f32.mrf.mxu3  ;;  %v547_v4 = vadd.f32 %v546_v2, %v528_v1  ;;  %v529_v6 = vpop.f32.mrf.mxu1  ;;  %v511_v9 = vadd.f32 %v510_v5, %v255_v7 }
  0xb6   : > { %v1117_v8 = vadd.f32 %v565_v3, %v547_v4  ;;  %v530_v12 = vadd.f32 %v529_v6, %v511_v9 }
  0xb8   : > { %v576_v10 = vsel %vm575_vm0, %v1117_v8, 0.0  ;;  %v588_v27 = vmul.f32 %v1117_v8, %v1117_v8 }
  0xb9   : > { %577 = vadd.xlane.f32.xlu2 %v576_v10 }
  0xba   : > { %v592_v33 = vsel %vm575_vm0, %v588_v27, 0.0 }
  0xbb   : > { %v548_v13 = vpop.f32.mrf.mxu2  ;;  %v513_v16 = vpop.f32.mrf.mxu0 }
  0xbc   : > { %v567_v14 = vpop.f32.mrf.mxu3  ;;  %v549_v15 = vadd.f32 %v548_v13, %v530_v12  ;;  %v532_v17 = vpop.f32.mrf.mxu1  ;;  %v514_v18 = vadd.f32 %v513_v16, %v260_v11 }
  0xbe   : > { %v1121_v19 = vadd.f32 %v567_v14, %v549_v15  ;;  %v533_v20 = vadd.f32 %v532_v17, %v514_v18 }
  0xc0   : > { %v579_v21 = vsel %vm575_vm0, %v1121_v19, 0.0  ;;  %v589_v37 = vmul.f32 %v1121_v19, %v1121_v19 }
  0xc1   : > { %580 = vadd.xlane.f32.xlu2 %v579_v21 }
  0xc2   : > { %v595_v40 = vsel %vm575_vm0, %v589_v37, 0.0 }
  0xc3   : > { %v551_v23 = vpop.f32.mrf.mxu2  ;;  %v515_v26 = vpop.f32.mrf.mxu0 }
  0xc4   : > { %v570_v24 = vpop.f32.mrf.mxu3  ;;  %v552_v25 = vadd.f32 %v551_v23, %v533_v20  ;;  %v516_v28 = vadd.f32 %v515_v26, %v265_v22  ;;  %v534_v29 = vpop.f32.mrf.mxu1 }
  0xc6   : > { %v1127_v30 = vadd.f32 %v570_v24, %v552_v25  ;;  %v535_v31 = vadd.f32 %v534_v29, %v516_v28 }
  0xc8   : > { %v582_v32 = vsel %vm575_vm0, %v1127_v30, 0.0  ;;  %v590_v41 = vmul.f32 %v1127_v30, %v1127_v30 }
  0xc9   : > { %583 = vadd.xlane.f32.xlu0 %v582_v32  ;;  %593 = vadd.xlane.f32.xlu2 %v592_v33 }
  0xca   : > { %v598_v42 = vsel %vm575_vm0, %v590_v41, 0.0 }
  0xcb   : > { %v553_v34 = vpop.f32.mrf.mxu2 }
  0xcc   : > { %v572_v35 = vpop.f32.mrf.mxu3  ;;  %v554_v36 = vadd.f32 %v553_v34, %v535_v31 }
  0xce   : > { %v1134_v38 = vadd.f32 %v572_v35, %v554_v36 }
  0xd0   : > { %v585_v39 = vsel %vm575_vm0, %v1134_v38, 0.0  ;;  %v591_v43 = vmul.f32 %v1134_v38, %v1134_v38 }
  0xd1   : > { %586 = vadd.xlane.f32.xlu1 %v585_v39  ;;  %596 = vadd.xlane.f32.xlu2 %v595_v40 }
  0xd2   : > { %v601_v44 = vsel %vm575_vm0, %v591_v43, 0.0 }
  0xd9   : > { %599 = vadd.xlane.f32.xlu2 %v598_v42 }
  0xe1   : > { %602 = vadd.xlane.f32.xlu2 %v601_v44 }
 0x12c   : > { %v578_v45 = vpop.xlane.xlu2 %577 }
 0x12d   : > { %v604_v47 = vmul.f32 0.0625, %v578_v45 }
 0x12f   : > { %v612_v49 = vmul.f32 %v604_v47, %v604_v47  ;;  %v620_v12 = vsub.f32 %v1117_v8, %v604_v47 }
 0x134   : > { %v581_v46 = vpop.xlane.xlu2 %580 }
 0x135   : > { %v605_v52 = vmul.f32 0.0625, %v581_v46 }
 0x137   : > { %v613_v55 = vmul.f32 %v605_v52, %v605_v52  ;;  %v621_v31 = vsub.f32 %v1121_v19, %v605_v52 }
 0x13c   : > { %v594_v48 = vpop.xlane.xlu2 %593  ;;  %v584_v57 = vpop.xlane.xlu0 %583 }
 0x13d   : > { %v608_v50 = vmul.f32 0.0625, %v594_v48  ;;  %v1145_v60 = vmul.f32 0.0625, %v584_v57 }
 0x13f   : > { %v616_v51 = vsub.f32 %v608_v50, %v612_v49  ;;  %v614_v63 = vmul.f32 %v1145_v60, %v1145_v60  ;;  %v622_v19 = vsub.f32 %v1127_v30, %v1145_v60 }
 0x141   : > { %v624_v53 = vadd.f32 1e-05, %v616_v51 }
 0x143   : > { %972 = vrsqrt.f32 %v624_v53  ;;  %vm634_vm2 = vweird.f32 %v624_v53 }
 0x144   : > { %v597_v54 = vpop.xlane.xlu2 %596  ;;  %v587_v6 = vpop.xlane.xlu1 %586 }
 0x145   : > { %v609_v56 = vmul.f32 0.0625, %v597_v54  ;;  %v607_v13 = vmul.f32 0.0625, %v587_v6 }
 0x147   : > { %v617_v58 = vsub.f32 %v609_v56, %v613_v55  ;;  %v615_v18 = vmul.f32 %v607_v13, %v607_v13 }
 0x149   : > { %v973_v59 = vpop.eup %972  ;;  %v625_v61 = vadd.f32 1e-05, %v617_v58 }
 0x14a   : > { %v629_v62 = vmul.f32 %v973_v59, %v624_v53  ;;  %vm635_vm1 = vweird.f32 %v973_v59  ;;  %v623_v53 = vsub.f32 %v1134_v38, %v607_v13 }
 0x14b   : > { %974 = vrsqrt.f32 %v625_v61  ;;  %vm636_vm3 = vmor %vm634_vm2, %vm635_vm1  ;;  %vm644_vm7 = vweird.f32 %v625_v61 }
 0x14c   : > { %v630_v0 = vmul.f32 %v973_v59, %v629_v62  ;;  %v600_v1 = vpop.xlane.xlu2 %599 }
 0x14d   : > { %v610_v2 = vmul.f32 0.0625, %v600_v1 }
 0x14e   : > { %v631_v3 = vmul.f32 0.5, %v630_v0 }
 0x14f   : > { %v618_v4 = vsub.f32 %v610_v2, %v614_v63 }
 0x150   : > { %v632_v5 = vsub.f32 1.5, %v631_v3 }
 0x151   : > { %v975_v7 = vpop.eup %974  ;;  %v626_v9 = vadd.f32 1e-05, %v618_v4 }
 0x152   : > { %v633_v10 = vmul.f32 %v973_v59, %v632_v5  ;;  %v639_v11 = vmul.f32 %v975_v7, %v625_v61  ;;  %vm645_vm5 = vweird.f32 %v975_v7 }
 0x153   : > { %976 = vrsqrt.f32 %v626_v9  ;;  %vm646_vm8 = vmor %vm644_vm7, %vm645_vm5  ;;  %vm654_vm11 = vweird.f32 %v626_v9 }
 0x154   : > { %v637_v14 = vsel %vm636_vm3, %v973_v59, %v633_v10  ;;  %v640_v15 = vmul.f32 %v975_v7, %v639_v11  ;;  %v603_v16 = vpop.xlane.xlu2 %602 }
 0x155   : > { %v668_v17 = vmul.f32 %v637_v14, %v620_v12  ;;  %v611_v20 = vmul.f32 0.0625, %v603_v16 }
 0x156   : > { %v641_v21 = vmul.f32 0.5, %v640_v15 }
 0x157   : > { %vm672_vm4 = vcmp.ge.f32.partialorder %v668_v17, 0.0  ;;  %v676_v22 = vmul.f32 0.2, %v668_v17  ;;  %v619_v23 = vsub.f32 %v611_v20, %v615_v18 }
 0x158   : > { %v642_v24 = vsub.f32 1.5, %v641_v21 }
 0x159   : > { %v977_v25 = vpop.eup %976  ;;  %v680_v8 = vsel %vm672_vm4, %v668_v17, %v676_v22  ;;  %v627_v26 = vadd.f32 1e-05, %v619_v23 }
 0x15a   : > { %v684_v27 = vpack.c.bf16 %v680_v8, %v680_v8  ;;  %v643_v28 = vmul.f32 %v975_v7, %v642_v24  ;;  %v649_v29 = vmul.f32 %v977_v25, %v626_v9  ;;  %vm655_vm10 = vweird.f32 %v977_v25 }
 0x15b   : > { %978 = vrsqrt.f32 %v627_v26  ;;  %vm656_vm12 = vmor %vm654_vm11, %vm655_vm10  ;;  %vm664_vm15 = vweird.f32 %v627_v26 }
 0x15c   : > { %689 = vst.msk [vmem:[%s1154_s9] sm:$0xf] %vm688_vm6, %v684_v27  ;;  %v647_v32 = vsel %vm646_vm8, %v975_v7, %v643_v28  ;;  %v650_v33 = vmul.f32 %v977_v25, %v649_v29 }
 0x15d   : > { %v669_v34 = vmul.f32 %v647_v32, %v621_v31 }
 0x15e   : > { %v651_v35 = vmul.f32 0.5, %v650_v33 }
 0x15f   : > { %vm673_vm9 = vcmp.ge.f32.partialorder %v669_v34, 0.0  ;;  %v677_v36 = vmul.f32 0.2, %v669_v34 }
 0x160   : > { %v652_v37 = vsub.f32 1.5, %v651_v35 }
 0x161   : > { %v979_v39 = vpop.eup %978  ;;  %v681_v40 = vsel %vm673_vm9, %v669_v34, %v677_v36 }
 0x162   : > { %v685_v41 = vpack.c.bf16 %v681_v40, %v681_v40  ;;  %v653_v42 = vmul.f32 %v977_v25, %v652_v37  ;;  %v659_v43 = vmul.f32 %v979_v39, %v627_v26  ;;  %vm665_vm14 = vweird.f32 %v979_v39 }
 0x163   : > { %vm666_vm0 = vmor %vm664_vm15, %vm665_vm14 }
 0x164   : > { %690 = vst.msk [vmem:[%s1154_s9 + $0x4] sm:$0xf] %vm688_vm6, %v685_v41  ;;  %v657_v44 = vsel %vm656_vm12, %v977_v25, %v653_v42  ;;  %v660_v45 = vmul.f32 %v979_v39, %v659_v43 }
 0x165   : > { %v670_v46 = vmul.f32 %v657_v44, %v622_v19 }
 0x166   : > { %v661_v47 = vmul.f32 0.5, %v660_v45 }
 0x167   : > { %vm674_vm13 = vcmp.ge.f32.partialorder %v670_v46, 0.0  ;;  %v678_v48 = vmul.f32 0.2, %v670_v46 }
 0x168   : > { %v662_v49 = vsub.f32 1.5, %v661_v47 }
 0x169   : > { %v682_v50 = vsel %vm674_vm13, %v670_v46, %v678_v48 }
 0x16a   : > { %v686_v51 = vpack.c.bf16 %v682_v50, %v682_v50  ;;  %v663_v52 = vmul.f32 %v979_v39, %v662_v49 }
 0x16c   : > { %691 = vst.msk [vmem:[%s1154_s9 + $0x8] sm:$0xf] %vm688_vm6, %v686_v51  ;;  %v667_v30 = vsel %vm666_vm0, %v979_v39, %v663_v52 }
 0x16d   : > { %v671_v54 = vmul.f32 %v667_v30, %v623_v53 }
 0x16f   : > { %vm675_vm1 = vcmp.ge.f32.partialorder %v671_v54, 0.0  ;;  %v679_v55 = vmul.f32 0.2, %v671_v54 }
 0x171   : > { %v683_v56 = vsel %vm675_vm1, %v671_v54, %v679_v55 }
 0x172   : > { %v687_v57 = vpack.c.bf16 %v683_v56, %v683_v56 }
 0x174   : > { %692 = vst.msk [vmem:[%s1154_s9 + $0xc] sm:$0xf] %vm688_vm6, %v687_v57 }
 0x175 PF: > { %s13_s12 = sadd.s32 1, %s986_s12  }
 0x176   : > { %p10_p4 = scmp.ge.s32.totalorder %s13_s12, 4  }
 0x178   :  { %12 = sbr.rel (!%p10_p4) target bundleno = 1 (0x1), region = 62 }

// kernel: run.9
= control target key start
LH: loop header
LB: loop body
LE: loop exit
PB: predicated region body
PF: predicated region fallthrough
CT: control target
= control target key end

     0   :  { %s756_s14 = smov 0   ;;  %s814_s0 = inlined_call_operand.vmem [shape: bf16[2,512,25], index: 0, kind: input, shape index: {}]   ;;  %s815_s1 = inlined_call_operand.vmem [shape: bf16[1,512], index: 1, kind: input, shape index: {}]   ;;  %s816_s2 = inlined_call_operand.<no memory space> [shape: f32[1,1], index: 2, kind: input, shape index: {}]   ;;  %s817_s3 = inlined_call_operand.vmem [shape: f32[2,1,25], index: 3, kind: output, shape index: {}]  }
   0x1   :  { %v8_v0 = vstv %s816_s2 }
   0x2   :  { %9 = vst [vmem:[#allocation2] sm:$0x1] %v8_v0 }
   0x3 LB: > { %s544_s15 = sadd.s32 4294967295, %s730_s14   ;;  %p548_p0 = scmp.ge.s32.totalorder %s730_s14, 1  ;;  %s730_s14 = sphi %s756_s14, %s15_s14  }
   0x4   : > { %p139_p1 = scmp.lt.s32.totalorder %s730_s14, 3 }
   0x6   : > { %p140_p2 = pnand %p548_p0, %p139_p1 }
   0x7   : > { %p161_p3 = scmp.lt.s32.totalorder (!%p140_p2), %s544_s15, 1 }
   0x8   : > { %143 = sbr.rel (%p140_p2) target bundleno = 191 (0xbf), region = 32 }
   0xd   : > { %v233_v1 = vld [vmem:[%s815_s1] sm:$0xf]  ;;  %s819_s15 = smov (!%p161_p3, %s544_s15), 1  ;;  %v732_v10 = vmov 0   ;;  %v234_v19 = vld [vmem:[#allocation2] sm:$0x1] }
   0xe   : > { %242 = vst [vmem:[#allocation1] ss:$9 sm:$0xff] %v233_v1  ;;  %s681_s2 = sshll.u32 %s819_s15, 8  ;;  %723 = vset.pattern.permute.xlu0 %v732_v10  ;;  %s168_s23 = scalar_lea.vmem %s817_s3, %s819_s15  ;;  %vm495_vm0 = vcmask 196608  }
   0xf   : > { %s773_s20 = scalar_lea.vmem %s814_s0, %s681_s2  ;;  %237 = vperm.xlu0 %723, %v234_v19  }
  0x10   : > { %v689_v2 = vld [vmem:[%s773_s20 + $0x38] sm:$0xff]  ;;  %v688_v6 = vld [vmem:[%s773_s20 + $0x30] sm:$0xff]  ;;  %v687_v11 = vld [vmem:[%s773_s20 + $0x28] sm:$0xff] }
  0x11   : > { %v697_v3 = vld [vmem:[%s773_s20 + $0x78] sm:$0xff]  ;;  %443 = vmatpush.bf16.msra.mxu0 %v689_v2  ;;  %v696_v7 = vld [vmem:[%s773_s20 + $0x70] sm:$0xff]  ;;  %v695_v12 = vld [vmem:[%s773_s20 + $0x68] sm:$0xff] }
  0x12   : > { %v705_v4 = vld [vmem:[%s773_s20 + $0xb8] sm:$0xff]  ;;  %456 = vmatpush.bf16.msra.mxu1 %v697_v3  ;;  %v704_v8 = vld [vmem:[%s773_s20 + $0xb0] sm:$0xff]  ;;  %v703_v13 = vld [vmem:[%s773_s20 + $0xa8] sm:$0xff] }
  0x13   : > { %v713_v5 = vld [vmem:[%s773_s20 + $0xf8] sm:$0xff]  ;;  %469 = vmatpush.bf16.msra.mxu2 %v705_v4  ;;  %v712_v9 = vld [vmem:[%s773_s20 + $0xf0] sm:$0xff]  ;;  %v711_v14 = vld [vmem:[%s773_s20 + $0xe8] sm:$0xff] }
  0x14   : > { %482 = vmatpush.bf16.msra.mxu3 %v713_v5  ;;  %v686_v15 = vld [vmem:[%s773_s20 + $0x20] sm:$0xff]  ;;  %v685_v20 = vld [vmem:[%s773_s20 + $0x18] sm:$0xff]  ;;  %v684_v24 = vld [vmem:[%s773_s20 + $0x10] sm:$0xff] }
  0x15   : > { %444 = vmatpush.bf16.msra.mxu0 %v688_v6  ;;  %v694_v16 = vld [vmem:[%s773_s20 + $0x60] sm:$0xff]  ;;  %v693_v21 = vld [vmem:[%s773_s20 + $0x58] sm:$0xff]  ;;  %v692_v25 = vld [vmem:[%s773_s20 + $0x50] sm:$0xff] }
  0x16   : > { %457 = vmatpush.bf16.msra.mxu1 %v696_v7  ;;  %v702_v17 = vld [vmem:[%s773_s20 + $0xa0] sm:$0xff]  ;;  %v701_v22 = vld [vmem:[%s773_s20 + $0x98] sm:$0xff]  ;;  %v700_v26 = vld [vmem:[%s773_s20 + $0x90] sm:$0xff] }
  0x17   : > { %470 = vmatpush.bf16.msra.mxu2 %v704_v8  ;;  %v710_v18 = vld [vmem:[%s773_s20 + $0xe0] sm:$0xff]  ;;  %v709_v23 = vld [vmem:[%s773_s20 + $0xd8] sm:$0xff]  ;;  %v708_v27 = vld [vmem:[%s773_s20 + $0xd0] sm:$0xff] }
  0x18   : > { %483 = vmatpush.bf16.msra.mxu3 %v712_v9  ;;  %v683_v28 = vld [vmem:[%s773_s20 + $0x8] sm:$0xff]  ;;  %v682_v32 = vld [vmem:[%s773_s20] sm:$0xff]  ;;  %v245_v38 = vld [vmem:[#allocation1 + $0x12] sm:$0xff] }
  0x19   : > { %445 = vmatpush.bf16.msra.mxu0 %v687_v11  ;;  %v691_v29 = vld [vmem:[%s773_s20 + $0x48] sm:$0xff]  ;;  %v690_v33 = vld [vmem:[%s773_s20 + $0x40] sm:$0xff] }
  0x1a   : > { %458 = vmatpush.bf16.msra.mxu1 %v695_v12  ;;  %v699_v30 = vld [vmem:[%s773_s20 + $0x88] sm:$0xff]  ;;  %v698_v34 = vld [vmem:[%s773_s20 + $0x80] sm:$0xff] }
  0x1b   : > { %471 = vmatpush.bf16.msra.mxu2 %v703_v13  ;;  %v707_v31 = vld [vmem:[%s773_s20 + $0xc8] sm:$0xff]  ;;  %v706_v35 = vld [vmem:[%s773_s20 + $0xc0] sm:$0xff] }
  0x1c   : > { %484 = vmatpush.bf16.msra.mxu3 %v711_v14  ;;  %v243_v36 = vld [vmem:[#allocation1] sm:$0xff]  ;;  %v244_v37 = vld [vmem:[#allocation1 + $0x9] sm:$0xff] }
  0x1d   : > { %446 = vmatpush.bf16.msra.mxu0 %v686_v15  ;;  %v246_v39 = vld [vmem:[#allocation1 + $0x1b] sm:$0xff] }
  0x1e   : > { %459 = vmatpush.bf16.msra.mxu1 %v694_v16 }
  0x1f   : > { %472 = vmatpush.bf16.msra.mxu2 %v702_v17 }
  0x20   : > { %485 = vmatpush.bf16.msra.mxu3 %v710_v18 }
  0x21   : > { %447 = vmatpush.bf16.msra.mxu0 %v685_v20 }
  0x22   : > { %460 = vmatpush.bf16.msra.mxu1 %v693_v21 }
  0x23   : > { %473 = vmatpush.bf16.msra.mxu2 %v701_v22 }
  0x24   : > { %486 = vmatpush.bf16.msra.mxu3 %v709_v23 }
  0x25   : > { %448 = vmatpush.bf16.msra.mxu0 %v684_v24 }
  0x26   : > { %461 = vmatpush.bf16.msra.mxu1 %v692_v25 }
  0x27   : > { %474 = vmatpush.bf16.msra.mxu2 %v700_v26 }
  0x28   : > { %487 = vmatpush.bf16.msra.mxu3 %v708_v27 }
  0x29   : > { %449 = vmatpush.bf16.msra.mxu0 %v683_v28 }
  0x2a   : > { %462 = vmatpush.bf16.msra.mxu1 %v691_v29 }
  0x2b   : > { %475 = vmatpush.bf16.msra.mxu2 %v699_v30 }
  0x2c   : > { %488 = vmatpush.bf16.msra.mxu3 %v707_v31 }
  0x2d   : > { %450 = vmatpush.bf16.msra.mxu0 %v682_v32 }
  0x2e   : > { %463 = vmatpush.bf16.msra.mxu1 %v690_v33 }
  0x2f   : > { %476 = vmatpush.bf16.msra.mxu2 %v698_v34 }
  0x30   : > { %489 = vmatpush.bf16.msra.mxu3 %v706_v35  ;;  %451 = vmatmul.bf16.vlgmr.msra.gmra.mxu0 %v243_v36 }
  0x31   : > { %464 = vmatmul.bf16.vlgmr.msra.gmra.mxu1 %v244_v37 }
  0x32   : > { %477 = vmatmul.bf16.vlgmr.msra.gmra.mxu2 %v245_v38 }
  0x33   : > { %490 = vmatmul.bf16.vlgmr.msra.gmra.mxu3 %v246_v39 }
  0x81   : > { %v238_v40 = vpop.permute.xlu0 %237 }
  0x82   : > { %v240_v41 = vperm.slane %v238_v40, 0 }
  0xad   : > { %v452_v42 = vpop.f32.mrf.mxu0 }
  0xae   : > { %v465_v43 = vpop.f32.mrf.mxu1  ;;  %v453_v44 = vadd.f32 %v452_v42, %v240_v41 }
  0xb0   : > { %v466_v45 = vadd.f32 %v465_v43, %v453_v44 }
  0xb5   : > { %v478_v46 = vpop.f32.mrf.mxu2  ;;  %v454_v49 = vpop.f32.mrf.mxu0 }
  0xb6   : > { %v491_v47 = vpop.f32.mrf.mxu3  ;;  %v479_v48 = vadd.f32 %v478_v46, %v466_v45  ;;  %v467_v50 = vpop.f32.mrf.mxu1 }
  0xb8   : > { %v492_v51 = vadd.f32 %v491_v47, %v479_v48 }
  0xba   : > { %496 = vst.msk [vmem:[%s168_s23] sm:$0x1] %vm495_vm0, %v492_v51 }
  0xbd   : > { %v480_v52 = vpop.f32.mrf.mxu2 }
  0xbe   : > { %v493_v53 = vpop.f32.mrf.mxu3 }
  0xbf PF: > { %s15_s14 = sadd.s32 1, %s730_s14  }
  0xc0   : > { %p12_p4 = scmp.ge.s32.totalorder %s15_s14, 4  }
  0xc2   :  { %14 = sbr.rel (!%p12_p4) target bundleno = 3 (0x3), region = 62 }

</bundles_post_ra>
